<compile_context>
chip_gen: v6e
topology: v6e:2x2x1
jax: 0.10.0
libtpu: 0.0.40
codegen_flags: <defaults>
</compile_context>

<pallas_src>
import functools

import jax
import jax.numpy as jnp
from jax.experimental import pallas as pl
from jax.experimental.pallas import tpu as pltpu


_MIB = 1024 * 1024
_VMEM_HEADROOM = 2 * _MIB          # Mosaic internal scratch / layout slack.
_GELU_APPROXIMATE = True           # tanh GELU (EUP slot).  NOTE: PyTorch
                                   # nn.GELU defaults to the erf form; flip
                                   # this if the wrapped module uses exact GELU.


def _round_up(x, m):
    return (x + m - 1) // m * m


def _cdiv(a, b):
    return -(-a // b)


@functools.lru_cache(maxsize=1)
def _vmem_config():
    """(budget_bytes, vmem_limit_bytes, prefer_even_grid) for this generation."""
    cap = 0
    try:
        cap = int(getattr(pltpu.get_tpu_info(), "vmem_capacity_bytes", 0) or 0)
    except Exception:
        cap = 0
    if cap >= 100 * _MIB:                      # v5e / v6e: 128 MiB physical VMEM
        return 96 * _MIB, 110 * _MIB, False
    # v7x (64 MiB per TensorCore) or unknown: stay conservative and prefer an
    # even number of parallel tiles so both TensorCores get equal work.
    return 40 * _MIB, 48 * _MIB, True


# ----------------------------------------------------------------------------
# Tile selection
# ----------------------------------------------------------------------------

def _pick_tile_m(M, max_tile=512, min_tile=128):
    """Token-axis tile: prefer an exact divisor of M (no padding, no slicing)."""
    if M <= max_tile:
        return M                                   # single full-dim tile
    for t in range(max_tile, min_tile - 1, -8):    # multiples of 8, descending
        if M % t == 0:
            return t
    # No exact divisor: pick the tile that minimizes row padding.
    num = _cdiv(M, max_tile)
    return _round_up(_cdiv(M, num), 8)


def _single_path_fits(tile_m, d_pad, x_bytes, out_bytes, budget):
    """VMEM fit for the single-x path (full W resident, x read exactly once)."""
    per_step = (tile_m * d_pad * x_bytes           # f32 x slab (MXU src + residual)
                + d_pad * d_pad * 2                # full bf16 W
                + 8 * d_pad * 4                    # bias (sublane-padded)
                + tile_m * d_pad * out_bytes)      # output slab
    temps = (tile_m * d_pad * 2                    # in-kernel bf16 cast of x
             + 2 * tile_m * d_pad * 4)             # f32 y / sum temporaries
    return 2 * per_step + temps + _VMEM_HEADROOM <= budget


def _pick_tile_n(tile_m, d_pad, out_bytes, budget, allow_128=True):
    """Output-column tile for the split-x path.  Prefers multiples of 256."""

    def fits(tn):
        per_step = (tile_m * d_pad * 2             # bf16 x slab (MXU operand)
                    + tile_m * tn * 4              # f32 residual tile
                    + d_pad * tn * 2               # bf16 W column tile
                    + 8 * tn * 4                   # bias tile (sublane-padded)
                    + tile_m * tn * out_bytes)     # output tile
        temps = 2 * tile_m * tn * 4                # f32 y / sum temporaries
        return 2 * per_step + temps + _VMEM_HEADROOM <= budget

    if d_pad <= 256:
        if fits(d_pad):
            return d_pad
        if allow_128 and fits(128):
            return 128
        return None

    for num_n in range(1, _cdiv(d_pad, 256) + 1):
        tn = max(256, _round_up(_cdiv(d_pad, num_n), 256))
        if tn * (num_n - 1) >= d_pad:              # redundant split
            continue
        if fits(tn):
            return tn
    if allow_128 and fits(128):
        return 128                                 # half-fills a 256-wide MXU
    return None


def _plan_dual(M, d_pad, tile_m0, out_bytes, budget):
    """(tile_m, tile_n) for the split-x path; shrink tile_m before tile_n<256."""
    cands = []
    for tm in (tile_m0, 256, 192, 128):
        if tm > tile_m0 or tm in cands:
            continue
        if tm != M and tm % 8 != 0:
            continue
        cands.append(tm)
    for allow_128 in (False, True):
        for tm in cands:
            tn = _pick_tile_n(tm, d_pad, out_bytes, budget, allow_128=allow_128)
            if tn is not None:
                return tm, tn
    return None


# ----------------------------------------------------------------------------
# Kernels
# ----------------------------------------------------------------------------

def _residual_kernel_single(x_ref, w_ref, b_ref, o_ref):
    """Single N tile: the f32 x slab is both the MXU-operand source and residual."""
    x = x_ref[...]
    y = jnp.dot(x.astype(jnp.bfloat16), w_ref[...],
                preferred_element_type=jnp.float32)
    y = y + b_ref[...].astype(jnp.float32)
    y = jax.nn.gelu(y, approximate=_GELU_APPROXIMATE)   # EUP slot
    o_ref[...] = (y + x.astype(jnp.float32)).astype(o_ref.dtype)


def _residual_kernel_split(x_mxu_ref, x_res_ref, w_ref, b_ref, o_ref):
    """Column-tiled: bf16 x slab feeds the MXU; separate f32 tile is the residual."""
    y = jnp.dot(x_mxu_ref[...], w_ref[...], preferred_element_type=jnp.float32)
    y = y + b_ref[...].astype(jnp.float32)
    y = jax.nn.gelu(y, approximate=_GELU_APPROXIMATE)
    o_ref[...] = (y + x_res_ref[...].astype(jnp.float32)).astype(o_ref.dtype)


def _residual_kernel_ktiled(x_mxu_ref, x_res_ref, w_ref, b_ref, o_ref, acc_ref):
    """K-tiled: f32 VMEM accumulator; init at k==0, bias+GELU+residual at k==last."""
    k = pl.program_id(2)

    @pl.when(k == 0)
    def _():
        acc_ref[...] = jnp.zeros_like(acc_ref)

    acc_ref[...] += jnp.dot(x_mxu_ref[...], w_ref[...],
                            preferred_element_type=jnp.float32)

    @pl.when(k == pl.num_programs(2) - 1)
    def _():
        y = acc_ref[...] + b_ref[...].astype(jnp.float32)
        y = jax.nn.gelu(y, approximate=_GELU_APPROXIMATE)
        o_ref[...] = (y + x_res_ref[...].astype(jnp.float32)).astype(o_ref.dtype)


# ----------------------------------------------------------------------------
# Wrapper
# ----------------------------------------------------------------------------

@functools.partial(jax.jit,
                   static_argnames=("tile_m", "tile_n", "tile_k", "force_path"))
def residual_dense(x, w, b, *, tile_m=None, tile_n=None, tile_k=None,
                   force_path=None):
    """Residual(GELU ∘ Linear): out = GELU(x @ W + b) + x.

    x: [B, N, D]; w: [D, D] (pass pre-cast bf16 to hoist the per-call cast out
    of the hot loop); b: [D].
    """
    B, N, D = x.shape
    M = B * N
    out_dtype = x.dtype
    x_bytes = x.dtype.itemsize
    out_bytes = jnp.dtype(out_dtype).itemsize

    budget, vmem_limit, prefer_even = _vmem_config()

    x2 = x.reshape(M, D)
    w_bf = w if w.dtype == jnp.bfloat16 else w.astype(jnp.bfloat16)
    b2 = b.reshape(1, D).astype(jnp.float32)

    d_pad = _round_up(D, 128)

    # ---- token-axis tile ----------------------------------------------------
    if tile_m is None:
        tile_m = _pick_tile_m(M)
    else:
        tile_m = max(8, min(tile_m, M))
        if tile_m != M:
            tile_m = _round_up(tile_m, 8)

    # ---- path selection (static, shape-driven) -------------------------------
    plan_tn = None
    if force_path is not None:
        path = force_path
    elif _single_path_fits(tile_m, d_pad, x_bytes, out_bytes, budget):
        path = "single"
    else:
        plan = _plan_dual(M, d_pad, tile_m, out_bytes, budget)
        if plan is not None:
            path = "split"
            tile_m, plan_tn = plan
        else:
            path = "ktiled"

    if path not in ("single", "split", "ktiled"):
        raise ValueError(f"unknown force_path={force_path!r}")

    # ---- column (N) / contraction (K) tiles per path --------------------------
    if path == "single":
        tile_n_eff, num_n = d_pad, 1
        tile_k_eff, num_k = d_pad, 1
    elif path == "split":
        if tile_n is not None:
            tile_n_eff = max(128, _round_up(tile_n, 128))
        elif plan_tn is not None:
            tile_n_eff = plan_tn
        else:
            tile_n_eff = _pick_tile_n(tile_m, d_pad, out_bytes, budget) or 128
        num_n = _cdiv(D, tile_n_eff)
        tile_k_eff, num_k = d_pad, 1
    else:  # ktiled
        tile_k_eff = max(128, _round_up(tile_k, 128)) if tile_k is not None else 512
        tile_n_eff = max(128, _round_up(tile_n, 128)) if tile_n is not None else 256
        num_n = _cdiv(D, tile_n_eff)
        num_k = _cdiv(D, tile_k_eff)

    n_pad = num_n * tile_n_eff
    k_pad = num_k * tile_k_eff if path == "ktiled" else d_pad

    # On 2-TensorCore parts, avoid an odd number of parallel tiles (one core
    # would idle on the tail tile): halve tile_m when that keeps tiles valid.
    num_m = _cdiv(M, tile_m)
    if (prefer_even and num_m > 1 and (num_m * num_n) % 2 == 1
            and tile_m % 16 == 0 and tile_m >= 128):
        tile_m //= 2
        num_m = _cdiv(M, tile_m)
    m_pad = num_m * tile_m
    needs_row_pad = m_pad != M

    # ---- padding + pallas_call per path --------------------------------------
    if path == "single":
        xp = x2
        if needs_row_pad or d_pad != D:
            xp = jnp.pad(x2, ((0, m_pad - M), (0, d_pad - D)))
        wp, bp = w_bf, b2
        if d_pad != D:
            wp = jnp.pad(w_bf, ((0, d_pad - D), (0, d_pad - D)))
            bp = jnp.pad(b2, ((0, 0), (0, d_pad - D)))

        cost = pl.CostEstimate(
            flops=2 * m_pad * d_pad * d_pad,
            transcendentals=m_pad * d_pad,
            bytes_accessed=(m_pad * d_pad * x_bytes + d_pad * d_pad * 2
                            + d_pad * 4 + m_pad * d_pad * out_bytes))

        out2 = pl.pallas_call(
            _residual_kernel_single,
            out_shape=jax.ShapeDtypeStruct((m_pad, d_pad), out_dtype),
            grid_spec=pltpu.PrefetchScalarGridSpec(
                num_scalar_prefetch=0,
                grid=(num_m,),
                in_specs=[
                    pl.BlockSpec((tile_m, d_pad), lambda i: (i, 0)),   # x slab
                    pl.BlockSpec((d_pad, d_pad), lambda i: (0, 0)),    # full W
                    pl.BlockSpec((1, d_pad), lambda i: (0, 0)),        # bias
                ],
                out_specs=pl.BlockSpec((tile_m, d_pad), lambda i: (i, 0)),
            ),
            compiler_params=pltpu.CompilerParams(
                dimension_semantics=("parallel",),
                vmem_limit_bytes=vmem_limit),
            cost_estimate=cost,
        )(xp, wp, bp)
        n_out = d_pad

    elif path == "split":
        xk = x2
        if needs_row_pad or d_pad != D:
            xk = jnp.pad(x2, ((0, m_pad - M), (0, d_pad - D)))
        x_mxu = xk.astype(jnp.bfloat16)              # cast once, wrapper-side
        x_res = x2
        if needs_row_pad or n_pad != D:
            x_res = jnp.pad(x2, ((0, m_pad - M), (0, n_pad - D)))
        wp, bp = w_bf, b2
        if d_pad != D or n_pad != D:
            wp = jnp.pad(w_bf, ((0, d_pad - D), (0, n_pad - D)))
        if n_pad != D:
            bp = jnp.pad(b2, ((0, 0), (0, n_pad - D)))

        cost = pl.CostEstimate(
            flops=2 * m_pad * d_pad * n_pad,
            transcendentals=m_pad * n_pad,
            bytes_accessed=(m_pad * d_pad * 2 * num_n    # bf16 x, re-read per N tile
                            + m_pad * n_pad * x_bytes    # f32 residual, read once
                            + d_pad * n_pad * 2 + n_pad * 4
                            + m_pad * n_pad * out_bytes))

        # TODO(synk): if profiling on v5e shows exposed DMA on the inner M loop,
        # bump the x/out BlockSpecs to pipeline_mode=pl.Buffered(3).
        out2 = pl.pallas_call(
            _residual_kernel_split,
            out_shape=jax.ShapeDtypeStruct((m_pad, n_pad), out_dtype),
            grid_spec=pltpu.PrefetchScalarGridSpec(
                num_scalar_prefetch=0,
                # N (W-column) tile outermost: each W column tile stays resident
                # while the token axis streams under it.
                grid=(num_n, num_m),
                in_specs=[
                    pl.BlockSpec((tile_m, d_pad), lambda j, i: (i, 0)),       # bf16 x
                    pl.BlockSpec((tile_m, tile_n_eff), lambda j, i: (i, j)),  # f32 res
                    pl.BlockSpec((d_pad, tile_n_eff), lambda j, i: (0, j)),   # W cols
                    pl.BlockSpec((1, tile_n_eff), lambda j, i: (0, j)),       # bias
                ],
                out_specs=pl.BlockSpec((tile_m, tile_n_eff), lambda j, i: (i, j)),
            ),
            compiler_params=pltpu.CompilerParams(
                dimension_semantics=("parallel", "parallel"),
                vmem_limit_bytes=vmem_limit),
            cost_estimate=cost,
        )(x_mxu, x_res, wp, bp)
        n_out = n_pad

    else:  # ktiled
        xk = x2
        if needs_row_pad or k_pad != D:
            xk = jnp.pad(x2, ((0, m_pad - M), (0, k_pad - D)))
        x_mxu = xk.astype(jnp.bfloat16)              # cast once, wrapper-side
        x_res = x2
        if needs_row_pad or n_pad != D:
            x_res = jnp.pad(x2, ((0, m_pad - M), (0, n_pad - D)))
        wp, bp = w_bf, b2
        if k_pad != D or n_pad != D:
            wp = jnp.pad(w_bf, ((0, k_pad - D), (0, n_pad - D)))
        if n_pad != D:
            bp = jnp.pad(b2, ((0, 0), (0, n_pad - D)))

        cost = pl.CostEstimate(
            flops=2 * m_pad * k_pad * n_pad,
            transcendentals=m_pad * n_pad,
            bytes_accessed=(m_pad * k_pad * 2 * num_n
                            + k_pad * n_pad * 2 * num_m
                            + m_pad * n_pad * x_bytes + n_pad * 4
                            + m_pad * n_pad * out_bytes))

        out2 = pl.pallas_call(
            _residual_kernel_ktiled,
            out_shape=jax.ShapeDtypeStruct((m_pad, n_pad), out_dtype),
            grid_spec=pltpu.PrefetchScalarGridSpec(
                num_scalar_prefetch=0,
                grid=(num_n, num_m, num_k),          # reduction (K) axis last
                in_specs=[
                    pl.BlockSpec((tile_m, tile_k_eff), lambda j, i, k: (i, k)),
                    pl.BlockSpec((tile_m, tile_n_eff), lambda j, i, k: (i, j)),
                    pl.BlockSpec((tile_k_eff, tile_n_eff), lambda j, i, k: (k, j)),
                    pl.BlockSpec((1, tile_n_eff), lambda j, i, k: (0, j)),
                ],
                out_specs=pl.BlockSpec((tile_m, tile_n_eff),
                                       lambda j, i, k: (i, j)),
                scratch_shapes=[pltpu.VMEM((tile_m, tile_n_eff), jnp.float32)],
            ),
            compiler_params=pltpu.CompilerParams(
                dimension_semantics=("parallel", "parallel", "arbitrary"),
                vmem_limit_bytes=vmem_limit),
            cost_estimate=cost,
        )(x_mxu, x_res, wp, bp)
        n_out = n_pad

    if m_pad != M or n_out != D:
        out2 = out2[:M, :D]
    return out2.reshape(B, N, D)


# ----------------------------------------------------------------------------
# References & checks
# ----------------------------------------------------------------------------

def _gelu(x):
    return jax.nn.gelu(x, approximate=_GELU_APPROXIMATE)


def _reference_f32(x, w, b):
    """Pure-f32 JAX reference: Residual(GELU ∘ Linear)."""
    return _gelu(jnp.einsum("bnd,de->bne", x, w) + b) + x


def _reference_bf16_matmul(x, w, b):
    """Reference with the kernel's bf16-operand / f32-accumulate matmul precision."""
    B, N, D = x.shape
    y = jnp.dot(x.reshape(-1, D).astype(jnp.bfloat16),
                w.astype(jnp.bfloat16), preferred_element_type=jnp.float32)
    return _gelu(y + b).reshape(B, N, D) + x


def _check(name, out, x, w_f32, b):
    assert out.shape == x.shape, name
    refbf = _reference_bf16_matmul(x, w_f32, b)
    ref32 = _reference_f32(x, w_f32, b)
    assert jnp.allclose(out, refbf, atol=5e-3, rtol=5e-3), \
        f"{name}: mismatch vs bf16-matmul reference"
    assert jnp.allclose(out, ref32, atol=5e-2, rtol=5e-2), \
        f"{name}: mismatch vs f32 reference"


if __name__ == "__main__":
    key = jax.random.PRNGKey(0)

    def make_inputs(k, B, N, D):
        kx, kw, kb = jax.random.split(k, 3)
        x = jax.random.normal(kx, (B, N, D), dtype=jnp.float32)
        w = jax.random.normal(kw, (D, D), dtype=jnp.float32) * (1.0 / jnp.sqrt(D))
        b = jax.random.normal(kb, (D,), dtype=jnp.float32) * 0.01
        return x, w, b

    k1, k2, k3, k4 = jax.random.split(key, 4)

    # 1) Main case: B=2, N=200, D=128 -> M=400 in one full-row tile; no padding,
    #    no output slice; single-x fused path; x read exactly once.
    x1, w1, b1 = make_inputs(k1, 2, 200, 128)
    w1_bf = w1.astype(jnp.bfloat16)          # hoisted one-time weight cast
    out1 = residual_dense(x1, w1_bf, b1)
    jax.block_until_ready(out1)
    _check("single", out1, x1, w1, b1)

    # 2) Split-x (column-tiled) path: bf16 MXU slab + separate f32 residual tile.
    x2_, w2_, b2_ = make_inputs(k2, 2, 64, 256)
    out2 = residual_dense(x2_, w2_.astype(jnp.bfloat16), b2_,
                          force_path="split", tile_n=128)
    jax.block_until_ready(out2)
    _check("split", out2, x2_, w2_, b2_)

    # 3) K-tiled accumulator path (pl.when init/finalize over the reduction axis).
    out3 = residual_dense(x2_, w2_.astype(jnp.bfloat16), b2_,
                          force_path="ktiled", tile_n=128, tile_k=128)
    jax.block_until_ready(out3)
    _check("ktiled", out3, x2_, w2_, b2_)

    # 4) Ragged shapes: token and feature axes that need padding + output slice.
    x4_, w4_, b4_ = make_inputs(k4, 2, 9, 100)
    out4 = residual_dense(x4_, w4_.astype(jnp.bfloat16), b4_, tile_m=8)
    jax.block_until_ready(out4)
    _check("ragged", out4, x4_, w4_, b4_)

    print("KERNEL_OK")
</pallas_src>

<mosaic_0001>
module attributes {stable_mosaic.version = 11 : i64} {
  func.func @_residual_kernel_single(%arg0: i32, %arg1: memref<400x128xf32, #tpu.memory_space<vmem>>, %arg2: memref<128x128xbf16, #tpu.memory_space<vmem>>, %arg3: memref<1x128xf32, #tpu.memory_space<vmem>>, %arg4: memref<400x128xf32, #tpu.memory_space<vmem>>) attributes {dimension_semantics = [#tpu.dimension_semantics<parallel>], iteration_bounds = array<i64: 1>, scalar_prefetch = 0 : i64, scratch_operands = 0 : i64, tpu.core_type = #tpu.core_type<tc>, window_params = [{transform_indices = @transform_0, window_bounds = array<i64: 400, 128>}, {pipeline_mode = #tpu.pipeline_mode<synchronous>, transform_indices = @transform_1, window_bounds = array<i64: 128, 128>}, {pipeline_mode = #tpu.pipeline_mode<synchronous>, transform_indices = @transform_2, window_bounds = array<i64: 1, 128>}, {transform_indices = @transform_3, window_bounds = array<i64: 400, 128>}]} {
    %c0 = arith.constant 0 : index
    %c0_0 = arith.constant 0 : index
    %0 = vector.load %arg1[%c0, %c0_0] : memref<400x128xf32, #tpu.memory_space<vmem>>, vector<400x128xf32>
    %1 = arith.truncf %0 : vector<400x128xf32> to vector<400x128xbf16>
    %c0_1 = arith.constant 0 : index
    %c0_2 = arith.constant 0 : index
    %2 = vector.load %arg2[%c0_1, %c0_2] : memref<128x128xbf16, #tpu.memory_space<vmem>>, vector<128x128xbf16>
    %cst = arith.constant dense<0.000000e+00> : vector<400x128xf32>
    %3 = tpu.matmul %1, %2, %cst {dimension_numbers = #tpu.dot_dimension_numbers<[1], [0], [0], [1], [0, 0, 1, 1], [], []>} : vector<400x128xbf16>, vector<128x128xbf16>, vector<400x128xf32> -> vector<400x128xf32>
    %c0_3 = arith.constant 0 : index
    %c0_4 = arith.constant 0 : index
    %4 = vector.load %arg3[%c0_3, %c0_4] : memref<1x128xf32, #tpu.memory_space<vmem>>, vector<1x128xf32>
    %5 = vector.broadcast %4 : vector<1x128xf32> to vector<400x128xf32>
    %6 = arith.addf %3, %5 : vector<400x128xf32>
    %7 = arith.mulf %6, %6 : vector<400x128xf32>
    %8 = arith.mulf %6, %7 : vector<400x128xf32>
    %cst_5 = arith.constant 4.471500e-02 : f32
    %9 = vector.broadcast %cst_5 : f32 to vector<400x128xf32>
    %10 = arith.mulf %9, %8 : vector<400x128xf32>
    %11 = arith.addf %6, %10 : vector<400x128xf32>
    %cst_6 = arith.constant 0.797884583 : f32
    %12 = vector.broadcast %cst_6 : f32 to vector<400x128xf32>
    %13 = arith.mulf %12, %11 : vector<400x128xf32>
    %14 = math.tanh %13 : vector<400x128xf32>
    %cst_7 = arith.constant 1.000000e+00 : f32
    %15 = vector.broadcast %cst_7 : f32 to vector<400x128xf32>
    %16 = arith.addf %15, %14 : vector<400x128xf32>
    %cst_8 = arith.constant 5.000000e-01 : f32
    %17 = vector.broadcast %cst_8 : f32 to vector<400x128xf32>
    %18 = arith.mulf %17, %16 : vector<400x128xf32>
    %19 = arith.mulf %6, %18 : vector<400x128xf32>
    %20 = arith.addf %19, %0 : vector<400x128xf32>
    %c0_9 = arith.constant 0 : index
    %c0_10 = arith.constant 0 : index
    %21 = vector.load %arg4[%c0_9, %c0_10] : memref<400x128xf32, #tpu.memory_space<vmem>>, vector<400x128xf32>
    tpu.vector_store %arg4[%c0_9, %c0_10], %20 {strides = array<i32>} : memref<400x128xf32, #tpu.memory_space<vmem>>, vector<400x128xf32>,
    return
  }
  func.func @transform_0(%arg0: i32) -> (i32, i32) {
    %c0_i32 = arith.constant 0 : i32
    %c0_i32_0 = arith.constant 0 : i32
    return %arg0, %c0_i32 : i32, i32
  }
  func.func @transform_1(%arg0: i32) -> (i32, i32) {
    %c0_i32 = arith.constant 0 : i32
    %c0_i32_0 = arith.constant 0 : i32
    %c0_i32_1 = arith.constant 0 : i32
    return %c0_i32, %c0_i32_0 : i32, i32
  }
  func.func @transform_2(%arg0: i32) -> (i32, i32) {
    %c0_i32 = arith.constant 0 : i32
    %c0_i32_0 = arith.constant 0 : i32
    %c0_i32_1 = arith.constant 0 : i32
    return %c0_i32, %c0_i32_0 : i32, i32
  }
  func.func @transform_3(%arg0: i32) -> (i32, i32) {
    %c0_i32 = arith.constant 0 : i32
    %c0_i32_0 = arith.constant 0 : i32
    return %arg0, %c0_i32 : i32, i32
  }
}

</mosaic_0001>

<bundles_post_ra>
// kernel: residual_dense.1
= control target key start
LH: loop header
LB: loop body
LE: loop exit
PB: predicated region body
PF: predicated region fallthrough
CT: control target
= control target key end

     0   :  { %8 = vsyncpa [#allocation3], 0  ;;  %s2072_s0 = inlined_call_operand.hbm [shape: f32[400,128], index: 0, kind: input, shape index: {}]   ;;  %s2073_s1 = inlined_call_operand.hbm [shape: bf16[128,128], index: 1, kind: input, shape index: {}]   ;;  %s2074_s2 = inlined_call_operand.vmem [shape: f32[1,128], index: 2, kind: input, shape index: {}]   ;;  %s2075_s3 = inlined_call_operand.hbm [shape: f32[400,128], index: 3, kind: output, shape index: {}]  }
   0x1   :  { %9 = vsyncpa [#allocation6], 0 }
   0x2   :  { %10 = vsyncpa [#allocation4], 0  ;;  %s1379_s12 = smov [#allocation2]  }
   0x3   :  { %s16_s13 = sshll.u32 %s1379_s12, 4  ;;  %s17_s13 = int_to_ptr.vmem [resolvable:$true] %s16_s13 }
   0x4   :  { %s1321_s14 = scalar_lea.vmem %s17_s13, 6400  ;;  %p1326_p1 = scmp.lt.s32.totalorder %s17_s13, %s17_s13 }
   0x5   :  { %p1322_p0 = scmp.ne.s32.totalorder %s17_s13, %s1321_s14  ;;  %p1327_p2 = scmp.lt.s32.totalorder %s1321_s14, %s1321_s14 }
   0x7   :  { %p1328_p3 = por %p1327_p2, %p1326_p1 }
   0x9   :  { %p1329_p4 = pnand %p1328_p3, %p1322_p0 }
   0xb   :  { %1332 = shalt.err (!%p1329_p4)
}
   0xc   :  { %s1380_s15 = smov 128   ;;  %s1381_s16 = smov 8  }
   0xd   :  { %22 = dma.hbm_to_vmem [thread:$0]  %s2072_s0, 6400, %s17_s13, [#allocation3], %s1380_s15, %s1380_s15, %s1381_s16  }
   0xe   :  { %s1382_s19 = smov [#allocation5]  }
   0xf   :  { %s28_s20 = sshll.u32 %s1382_s19, 4  ;;  %s29_s20 = int_to_ptr.vmem [resolvable:$true] %s28_s20 }
  0x10   :  { %s1341_s21 = scalar_lea.vmem %s29_s20, 1024  ;;  %p1346_p6 = scmp.lt.s32.totalorder %s29_s20, %s29_s20 }
  0x11   :  { %p1342_p5 = scmp.ne.s32.totalorder %s29_s20, %s1341_s21  ;;  %p1347_p7 = scmp.lt.s32.totalorder %s1341_s21, %s1341_s21 }
  0x13   :  { %p1348_p8 = por %p1347_p7, %p1346_p6 }
  0x15   :  { %p1349_p9 = pnand %p1348_p8, %p1342_p5 }
  0x17   :  { %1352 = shalt.err (!%p1349_p9)
}
  0x18   :  { %s1383_s22 = smov 64   ;;  %s1384_s23 = smov 4  }
  0x19   :  { %34 = dma.hbm_to_vmem [thread:$0]  %s2073_s1, 1024, %s29_s20, [#allocation6], %s1383_s22, %s1383_s22, %s1384_s23  }
  0x1a   :  { %1373 = dma.done.wait [#allocation3], 6400  }
  0x1b   :  { %1374 = vsyncadd [#allocation3], 4294960896 }
  0x1c   :  { %1375 = dma.done.wait [#allocation6], 1024  }
  0x1d   :  { %1376 = vsyncadd [#allocation6], 4294966272  ;;  %v1385_v0 = vmov 0.0   ;;  %vm1386_vm0 = vmmov 0   ;;  %v1174_v1 = vld [vmem:[#allocation5 + $0x38] sm:$0xff]   ;;  %v1175_v2 = vld [vmem:[#allocation5 + $0x30] sm:$0xff]  }
  0x1e   :  { %1033 = vmatprep.subr.bf16.mxu0 %v1385_v0  ;;  %1149 = vmatprep.subr.bf16.mxu1 %v1385_v0  ;;  %v1176_v3 = vld [vmem:[#allocation5 + $0x28] sm:$0xff]   ;;  %v1177_v4 = vld [vmem:[#allocation5 + $0x20] sm:$0xff]   ;;  %v1178_v5 = vld [vmem:[#allocation5 + $0x18] sm:$0xff]  }
  0x1f   :  { %1049 = vmatprep.mubr.msk.bf16.mxu0 %vm1386_vm0, %v1385_v0  ;;  %1101 = vmatprep.mubr.msk.bf16.mxu1 %vm1386_vm0, %v1385_v0  ;;  %v1179_v6 = vld [vmem:[#allocation5 + $0x10] sm:$0xff]   ;;  %v1180_v7 = vld [vmem:[#allocation5 + $0x8] sm:$0xff]   ;;  %v1181_v8 = vld [vmem:[#allocation5] sm:$0xff]  }
  0x20   :  { %1034 = vmatpush3.bf16.msra.mxu0 %v1174_v1  ;;  %1157 = vmatpush3.bf16.msra.mxu1 %v1174_v1  ;;  %v1435_v9 = vld [vmem:[#allocation2] sm:$0xff]  ;;  %v1437_v10 = vld [vmem:[#allocation2 + $0x8] sm:$0xff]  ;;  %v1439_v11 = vld [vmem:[#allocation2 + $0xd0] sm:$0xff] }
  0x21   :  { %1035 = vmatprep.subr.bf16.mxu0 %v1385_v0  ;;  %1150 = vmatprep.subr.bf16.mxu1 %v1385_v0  ;;  %v1441_v12 = vld [vmem:[#allocation2 + $0xd8] sm:$0xff]  ;;  %v94_v13 = vpack.c.bf16 %v1437_v10, %v1435_v9  ;;  %v1449_v15 = vld [vmem:[#allocation2 + $0x10] sm:$0xff]  ;;  %v1457_v17 = vld [vmem:[#allocation2 + $0xe0] sm:$0xff] }
  0x22   :  { %v107_v14 = vpack.c.bf16 %v1441_v12, %v1439_v11  ;;  %v1455_v16 = vld [vmem:[#allocation2 + $0x18] sm:$0xff]  ;;  %v1459_v18 = vld [vmem:[#allocation2 + $0xe8] sm:$0xff]  ;;  %v1465_v21 = vld [vmem:[#allocation2 + $0x20] sm:$0xff] }
  0x23   :  { %v95_v19 = vpack.c.bf16 %v1455_v16, %v1449_v15  ;;  %v108_v20 = vpack.c.bf16 %v1459_v18, %v1457_v17  ;;  %v1471_v22 = vld [vmem:[#allocation2 + $0x28] sm:$0xff]  ;;  %v1473_v23 = vld [vmem:[#allocation2 + $0xf0] sm:$0xff]  ;;  %v1475_v24 = vld [vmem:[#allocation2 + $0xf8] sm:$0xff] }
  0x24   :  { %1036 = vmatpush3.bf16.msra.mxu0 %v1175_v2  ;;  %1158 = vmatpush3.bf16.msra.mxu1 %v1175_v2  ;;  %v96_v25 = vpack.c.bf16 %v1471_v22, %v1465_v21  ;;  %v109_v26 = vpack.c.bf16 %v1475_v24, %v1473_v23  ;;  %v1481_v27 = vld [vmem:[#allocation2 + $0x30] sm:$0xff]  ;;  %v1487_v28 = vld [vmem:[#allocation2 + $0x38] sm:$0xff]  ;;  %v1489_v29 = vld [vmem:[#allocation2 + $0x100] sm:$0xff] }
  0x25   :  { %1037 = vmatprep.subr.bf16.mxu0 %v1385_v0  ;;  %1151 = vmatprep.subr.bf16.mxu1 %v1385_v0  ;;  %v1491_v30 = vld [vmem:[#allocation2 + $0x108] sm:$0xff]  ;;  %v97_v31 = vpack.c.bf16 %v1487_v28, %v1481_v27  ;;  %v1497_v33 = vld [vmem:[#allocation2 + $0x40] sm:$0xff]  ;;  %v1505_v35 = vld [vmem:[#allocation2 + $0x110] sm:$0xff] }
  0x26   :  { %v110_v32 = vpack.c.bf16 %v1491_v30, %v1489_v29  ;;  %v1503_v34 = vld [vmem:[#allocation2 + $0x48] sm:$0xff]  ;;  %v1507_v36 = vld [vmem:[#allocation2 + $0x118] sm:$0xff]  ;;  %v54_v39 = vld [vmem:[#allocation2 + $0x50] sm:$0xff] }
  0x27   :  { %v98_v37 = vpack.c.bf16 %v1503_v34, %v1497_v33  ;;  %v111_v38 = vpack.c.bf16 %v1507_v36, %v1505_v35  ;;  %v55_v40 = vld [vmem:[#allocation2 + $0x58] sm:$0xff]  ;;  %v80_v41 = vld [vmem:[#allocation2 + $0x120] sm:$0xff]  ;;  %v81_v42 = vld [vmem:[#allocation2 + $0x128] sm:$0xff] }
  0x28   :  { %1038 = vmatpush3.bf16.msra.mxu0 %v1176_v3  ;;  %1159 = vmatpush3.bf16.msra.mxu1 %v1176_v3  ;;  %v99_v43 = vpack.c.bf16 %v55_v40, %v54_v39  ;;  %v112_v44 = vpack.c.bf16 %v81_v42, %v80_v41  ;;  %v56_v45 = vld [vmem:[#allocation2 + $0x60] sm:$0xff]  ;;  %v57_v46 = vld [vmem:[#allocation2 + $0x68] sm:$0xff]  ;;  %v82_v47 = vld [vmem:[#allocation2 + $0x130] sm:$0xff] }
  0x29   :  { %1039 = vmatprep.subr.bf16.mxu0 %v1385_v0  ;;  %1152 = vmatprep.subr.bf16.mxu1 %v1385_v0  ;;  %v83_v48 = vld [vmem:[#allocation2 + $0x138] sm:$0xff]  ;;  %v100_v49 = vpack.c.bf16 %v57_v46, %v56_v45  ;;  %v58_v51 = vld [vmem:[#allocation2 + $0x70] sm:$0xff]  ;;  %v84_v53 = vld [vmem:[#allocation2 + $0x140] sm:$0xff] }
  0x2a   :  { %v113_v50 = vpack.c.bf16 %v83_v48, %v82_v47  ;;  %v59_v52 = vld [vmem:[#allocation2 + $0x78] sm:$0xff]  ;;  %v85_v54 = vld [vmem:[#allocation2 + $0x148] sm:$0xff]  ;;  %v60_v57 = vld [vmem:[#allocation2 + $0x80] sm:$0xff] }
  0x2b   :  { %v101_v55 = vpack.c.bf16 %v59_v52, %v58_v51  ;;  %v114_v56 = vpack.c.bf16 %v85_v54, %v84_v53  ;;  %v61_v58 = vld [vmem:[#allocation2 + $0x88] sm:$0xff]  ;;  %v86_v59 = vld [vmem:[#allocation2 + $0x150] sm:$0xff]  ;;  %v87_v60 = vld [vmem:[#allocation2 + $0x158] sm:$0xff] }
  0x2c   :  { %1040 = vmatpush3.bf16.msra.mxu0 %v1177_v4  ;;  %1160 = vmatpush3.bf16.msra.mxu1 %v1177_v4  ;;  %v102_v61 = vpack.c.bf16 %v61_v58, %v60_v57  ;;  %v115_v62 = vpack.c.bf16 %v87_v60, %v86_v59  ;;  %v62_v63 = vld [vmem:[#allocation2 + $0x90] sm:$0xff]  ;;  %v63_v1 = vld [vmem:[#allocation2 + $0x98] sm:$0xff]  ;;  %v88_v2 = vld [vmem:[#allocation2 + $0x160] sm:$0xff] }
  0x2d   :  { %1041 = vmatprep.subr.bf16.mxu0 %v1385_v0  ;;  %1153 = vmatprep.subr.bf16.mxu1 %v1385_v0  ;;  %v89_v3 = vld [vmem:[#allocation2 + $0x168] sm:$0xff]  ;;  %v103_v4 = vpack.c.bf16 %v63_v1, %v62_v63  ;;  %v1546_v41 = vld [vmem:[%s2074_s2] ss:$0 sm:$0xff] }
  0x2e   :  { %v69_v39 = vld [vmem:[#allocation2 + $0xc8] sm:$0xff] }
  0x30   :  { %1042 = vmatpush3.bf16.msra.mxu0 %v1178_v5  ;;  %1161 = vmatpush3.bf16.msra.mxu1 %v1178_v5  ;;  %v116_v5 = vpack.c.bf16 %v89_v3, %v88_v2 }
  0x31   :  { %1043 = vmatprep.subr.bf16.mxu0 %v1385_v0  ;;  %1154 = vmatprep.subr.bf16.mxu1 %v1385_v0 }
  0x34   :  { %1044 = vmatpush3.bf16.msra.mxu0 %v1179_v6  ;;  %1162 = vmatpush3.bf16.msra.mxu1 %v1179_v6  ;;  %v64_v6 = vld [vmem:[#allocation2 + $0xa0] sm:$0xff] }
  0x35   :  { %1045 = vmatprep.subr.bf16.mxu0 %v1385_v0  ;;  %1155 = vmatprep.subr.bf16.mxu1 %v1385_v0 }
  0x38   :  { %1046 = vmatpush3.bf16.msra.mxu0 %v1180_v7  ;;  %1163 = vmatpush3.bf16.msra.mxu1 %v1180_v7  ;;  %v65_v7 = vld [vmem:[#allocation2 + $0xa8] sm:$0xff] }
  0x39   :  { %1047 = vmatprep.subr.bf16.mxu0 %v1385_v0  ;;  %1156 = vmatprep.subr.bf16.mxu1 %v1385_v0 }
  0x3c   :  { %1048 = vmatpush3.bf16.msra.mxu0 %v1181_v8  ;;  %1164 = vmatpush3.bf16.msra.mxu1 %v1181_v8  ;;  %v90_v8 = vld [vmem:[#allocation2 + $0x170] sm:$0xff] }
  0x3f   :  { %1050 = vmatmul.mubr.bf16.vlgmr.msra.gmra.mxu0 %v94_v13  ;;  %1102 = vmatmul.mubr.bf16.vlgmr.msra.gmra.mxu1 %v107_v14  ;;  %v91_v13 = vld [vmem:[#allocation2 + $0x178] sm:$0xff]  ;;  %v104_v14 = vpack.c.bf16 %v65_v7, %v64_v6 }
  0x40   :  { %1053 = vmatprep.mubr.msk.bf16.mxu0 %vm1386_vm0, %v1385_v0  ;;  %1105 = vmatprep.mubr.msk.bf16.mxu1 %vm1386_vm0, %v1385_v0 }
  0x47   :  { %1054 = vmatmul.mubr.bf16.gmra.mxu0 %v95_v19  ;;  %1106 = vmatmul.mubr.bf16.gmra.mxu1 %v108_v20  ;;  %v117_v19 = vpack.c.bf16 %v91_v13, %v90_v8  ;;  %v66_v20 = vld [vmem:[#allocation2 + $0xb0] sm:$0xff] }
  0x48   :  { %1057 = vmatprep.mubr.msk.bf16.mxu0 %vm1386_vm0, %v1385_v0  ;;  %1109 = vmatprep.mubr.msk.bf16.mxu1 %vm1386_vm0, %v1385_v0 }
  0x4f   :  { %1058 = vmatmul.mubr.bf16.gmra.mxu0 %v96_v25  ;;  %1110 = vmatmul.mubr.bf16.gmra.mxu1 %v109_v26  ;;  %v67_v25 = vld [vmem:[#allocation2 + $0xb8] sm:$0xff]  ;;  %v92_v26 = vld [vmem:[#allocation2 + $0x180] sm:$0xff] }
  0x50   :  { %1061 = vmatprep.mubr.msk.bf16.mxu0 %vm1386_vm0, %v1385_v0  ;;  %1113 = vmatprep.mubr.msk.bf16.mxu1 %vm1386_vm0, %v1385_v0 }
  0x57   :  { %1062 = vmatmul.mubr.bf16.gmra.mxu0 %v97_v31  ;;  %1114 = vmatmul.mubr.bf16.gmra.mxu1 %v110_v32  ;;  %v93_v31 = vld [vmem:[#allocation2 + $0x188] sm:$0xff]  ;;  %v105_v32 = vpack.c.bf16 %v67_v25, %v66_v20 }
  0x58   :  { %1065 = vmatprep.mubr.msk.bf16.mxu0 %vm1386_vm0, %v1385_v0  ;;  %1117 = vmatprep.mubr.msk.bf16.mxu1 %vm1386_vm0, %v1385_v0 }
  0x5f   :  { %1066 = vmatmul.mubr.bf16.gmra.mxu0 %v98_v37  ;;  %1118 = vmatmul.mubr.bf16.gmra.mxu1 %v111_v38  ;;  %v118_v37 = vpack.c.bf16 %v93_v31, %v92_v26  ;;  %v68_v38 = vld [vmem:[#allocation2 + $0xc0] sm:$0xff] }
  0x60   :  { %1069 = vmatprep.mubr.msk.bf16.mxu0 %vm1386_vm0, %v1385_v0  ;;  %1121 = vmatprep.mubr.msk.bf16.mxu1 %vm1386_vm0, %v1385_v0  ;;  %v106_v40 = vpack.c.bf16 %v69_v39, %v68_v38 }
  0x67   :  { %1070 = vmatmul.mubr.bf16.gmra.mxu0 %v99_v43  ;;  %1122 = vmatmul.mubr.bf16.gmra.mxu1 %v112_v44 }
  0x68   :  { %1073 = vmatprep.mubr.msk.bf16.mxu0 %vm1386_vm0, %v1385_v0  ;;  %1125 = vmatprep.mubr.msk.bf16.mxu1 %vm1386_vm0, %v1385_v0 }
  0x6f   :  { %1074 = vmatmul.mubr.bf16.gmra.mxu0 %v100_v49  ;;  %1126 = vmatmul.mubr.bf16.gmra.mxu1 %v113_v50 }
  0x70   :  { %1077 = vmatprep.mubr.msk.bf16.mxu0 %vm1386_vm0, %v1385_v0  ;;  %1129 = vmatprep.mubr.msk.bf16.mxu1 %vm1386_vm0, %v1385_v0 }
  0x77   :  { %1078 = vmatmul.mubr.bf16.gmra.mxu0 %v101_v55  ;;  %1130 = vmatmul.mubr.bf16.gmra.mxu1 %v114_v56 }
  0x78   :  { %1081 = vmatprep.mubr.msk.bf16.mxu0 %vm1386_vm0, %v1385_v0  ;;  %1133 = vmatprep.mubr.msk.bf16.mxu1 %vm1386_vm0, %v1385_v0 }
  0x7f   :  { %1082 = vmatmul.mubr.bf16.gmra.mxu0 %v102_v61  ;;  %1134 = vmatmul.mubr.bf16.gmra.mxu1 %v115_v62 }
  0x80   :  { %1085 = vmatprep.mubr.msk.bf16.mxu0 %vm1386_vm0, %v1385_v0  ;;  %1137 = vmatprep.mubr.msk.bf16.mxu1 %vm1386_vm0, %v1385_v0 }
  0x87   :  { %1086 = vmatmul.mubr.bf16.gmra.mxu0 %v103_v4  ;;  %1138 = vmatmul.mubr.bf16.gmra.mxu1 %v116_v5 }
  0x88   :  { %1089 = vmatprep.mubr.msk.bf16.mxu0 %vm1386_vm0, %v1385_v0  ;;  %1141 = vmatprep.mubr.msk.bf16.mxu1 %vm1386_vm0, %v1385_v0 }
  0x8f   :  { %1090 = vmatmul.mubr.bf16.gmra.mxu0 %v104_v14  ;;  %1142 = vmatmul.mubr.bf16.gmra.mxu1 %v117_v19 }
  0x90   :  { %1093 = vmatprep.mubr.msk.bf16.mxu0 %vm1386_vm0, %v1385_v0  ;;  %1145 = vmatprep.mubr.msk.bf16.mxu1 %vm1386_vm0, %v1385_v0 }
  0x97   :  { %1094 = vmatmul.mubr.bf16.gmra.mxu0 %v105_v32  ;;  %1146 = vmatmul.mubr.bf16.gmra.mxu1 %v118_v37 }
  0x98   :  { %1097 = vmatprep.mubr.msk.bf16.mxu0 %vm1386_vm0, %v1385_v0 }
  0x9f   :  { %1098 = vmatmul.mubr.bf16.gmra.mxu0 %v106_v40 }
  0xff   :  { %v224_v42 = vpop.f32.mrf.mxu0  ;;  %v328_v43 = vpop.f32.mrf.mxu1 }
 0x100   :  { %v1549_v44 = vadd.f32 %v1546_v41, %v224_v42  ;;  %v1552_v45 = vadd.f32 %v1546_v41, %v328_v43 }
 0x101   :  { %v1051_v46 = vpop.f32.mrf.mxu0  ;;  %v1103_v47 = vpop.f32.mrf.mxu1 }
 0x102   :  { %v423_v0 = vmul.f32 %v1549_v44, %v1549_v44  ;;  %v449_v48 = vmul.f32 %v1552_v45, %v1552_v45 }
 0x103   :  { %v227_v49 = vpop.f32.mrf.mxu0  ;;  %v331_v50 = vpop.f32.mrf.mxu1 }
 0x104   :  { %v473_v51 = vmul.f32 %v423_v0, %v1549_v44  ;;  %v499_v52 = vmul.f32 %v449_v48, %v1552_v45  ;;  %v1561_v53 = vadd.f32 %v1546_v41, %v227_v49  ;;  %v1564_v54 = vadd.f32 %v1546_v41, %v331_v50 }
 0x105   :  { %v1052_v55 = vpop.f32.mrf.mxu0  ;;  %v1104_v56 = vpop.f32.mrf.mxu1 }
 0x106   :  { %v523_v57 = vmul.f32 0.044715, %v473_v51  ;;  %v549_v58 = vmul.f32 0.044715, %v499_v52  ;;  %v424_v59 = vmul.f32 %v1561_v53, %v1561_v53  ;;  %v450_v60 = vmul.f32 %v1564_v54, %v1564_v54 }
 0x107   :  { %v232_v61 = vpop.f32.mrf.mxu0  ;;  %v336_v62 = vpop.f32.mrf.mxu1 }
 0x108   :  { %v573_v63 = vadd.f32 %v523_v57, %v1549_v44  ;;  %v599_v1 = vadd.f32 %v549_v58, %v1552_v45  ;;  %v474_v2 = vmul.f32 %v424_v59, %v1561_v53  ;;  %v500_v3 = vmul.f32 %v450_v60, %v1564_v54 }
 0x109   :  { %v1575_v4 = vadd.f32 %v1546_v41, %v232_v61  ;;  %v1578_v5 = vadd.f32 %v1546_v41, %v336_v62  ;;  %v1055_v6 = vpop.f32.mrf.mxu0  ;;  %v1107_v7 = vpop.f32.mrf.mxu1 }
 0x10a   :  { %v623_v8 = vmul.f32 0.7978846, %v573_v63  ;;  %v649_v13 = vmul.f32 0.7978846, %v599_v1  ;;  %v524_v14 = vmul.f32 0.044715, %v474_v2 }
 0x10b   :  { %v550_v19 = vmul.f32 0.044715, %v500_v3  ;;  %v425_v20 = vmul.f32 %v1575_v4, %v1575_v4  ;;  %v451_v25 = vmul.f32 %v1578_v5, %v1578_v5  ;;  %v235_v26 = vpop.f32.mrf.mxu0  ;;  %v339_v31 = vpop.f32.mrf.mxu1 }
 0x10c   :  { %1182 = vtanh.f32 %v623_v8  ;;  %v574_v32 = vadd.f32 %v524_v14, %v1561_v53  ;;  %v1586_v37 = vadd.f32 %v1546_v41, %v235_v26  ;;  %v1589_v38 = vadd.f32 %v1546_v41, %v339_v31 }
 0x10d   :  { %1184 = vtanh.f32 %v649_v13  ;;  %v600_v39 = vadd.f32 %v550_v19, %v1564_v54  ;;  %v475_v40 = vmul.f32 %v425_v20, %v1575_v4  ;;  %v501_v42 = vmul.f32 %v451_v25, %v1578_v5  ;;  %v1056_v43 = vpop.f32.mrf.mxu0  ;;  %v1108_v46 = vpop.f32.mrf.mxu1 }
 0x10e   :  { %v624_v47 = vmul.f32 0.7978846, %v574_v32  ;;  %v426_v0 = vmul.f32 %v1586_v37, %v1586_v37  ;;  %v452_v48 = vmul.f32 %v1589_v38, %v1589_v38 }
 0x10f   :  { %v650_v49 = vmul.f32 0.7978846, %v600_v39  ;;  %v525_v50 = vmul.f32 0.044715, %v475_v40  ;;  %v551_v51 = vmul.f32 0.044715, %v501_v42  ;;  %v240_v52 = vpop.f32.mrf.mxu0  ;;  %v344_v55 = vpop.f32.mrf.mxu1 }
 0x110   :  { %1186 = vtanh.f32 %v624_v47  ;;  %v476_v56 = vmul.f32 %v426_v0, %v1586_v37  ;;  %v502_v57 = vmul.f32 %v452_v48, %v1589_v38  ;;  %v1601_v58 = vadd.f32 %v1546_v41, %v240_v52 }
 0x111   :  { %1188 = vtanh.f32 %v650_v49  ;;  %v575_v59 = vadd.f32 %v525_v50, %v1575_v4  ;;  %v601_v60 = vadd.f32 %v551_v51, %v1578_v5  ;;  %v1606_v61 = vadd.f32 %v1546_v41, %v344_v55  ;;  %v1059_v62 = vpop.f32.mrf.mxu0  ;;  %v1111_v63 = vpop.f32.mrf.mxu1 }
 0x112   :  { %v526_v1 = vmul.f32 0.044715, %v476_v56  ;;  %v552_v2 = vmul.f32 0.044715, %v502_v57  ;;  %v427_v3 = vmul.f32 %v1601_v58, %v1601_v58 }
 0x113   :  { %v625_v6 = vmul.f32 0.7978846, %v575_v59  ;;  %v651_v7 = vmul.f32 0.7978846, %v601_v60  ;;  %v453_v8 = vmul.f32 %v1606_v61, %v1606_v61  ;;  %v243_v13 = vpop.f32.mrf.mxu0  ;;  %v347_v14 = vpop.f32.mrf.mxu1 }
 0x114   :  { %v576_v19 = vadd.f32 %v526_v1, %v1586_v37  ;;  %v602_v20 = vadd.f32 %v552_v2, %v1589_v38  ;;  %v477_v25 = vmul.f32 %v427_v3, %v1601_v58  ;;  %v1616_v26 = vadd.f32 %v1546_v41, %v243_v13 }
 0x115   :  { %1190 = vtanh.f32 %v625_v6  ;;  %v503_v31 = vmul.f32 %v453_v8, %v1606_v61  ;;  %v1620_v32 = vadd.f32 %v1546_v41, %v347_v14  ;;  %v1060_v39 = vpop.f32.mrf.mxu0  ;;  %v1112_v40 = vpop.f32.mrf.mxu1 }
 0x116   :  { %1192 = vtanh.f32 %v651_v7  ;;  %v626_v42 = vmul.f32 0.7978846, %v576_v19  ;;  %v652_v43 = vmul.f32 0.7978846, %v602_v20  ;;  %v527_v46 = vmul.f32 0.044715, %v477_v25 }
 0x117   :  { %v553_v47 = vmul.f32 0.044715, %v503_v31  ;;  %v428_v0 = vmul.f32 %v1616_v26, %v1616_v26  ;;  %v454_v48 = vmul.f32 %v1620_v32, %v1620_v32  ;;  %v248_v49 = vpop.f32.mrf.mxu0  ;;  %v352_v50 = vpop.f32.mrf.mxu1 }
 0x118   :  { %1194 = vtanh.f32 %v626_v42  ;;  %v577_v51 = vadd.f32 %v527_v46, %v1601_v58  ;;  %v1628_v52 = vadd.f32 %v1546_v41, %v248_v49  ;;  %v1631_v55 = vadd.f32 %v1546_v41, %v352_v50 }
 0x119   :  { %v1183_v56 = vpop.eup %1182  ;;  %1196 = vtanh.f32 %v652_v43  ;;  %v603_v57 = vadd.f32 %v553_v47, %v1606_v61  ;;  %v478_v59 = vmul.f32 %v428_v0, %v1616_v26  ;;  %v504_v60 = vmul.f32 %v454_v48, %v1620_v32  ;;  %v1063_v62 = vpop.f32.mrf.mxu0 }
 0x11a   :  { %v1115_v63 = vpop.f32.mrf.mxu1  ;;  %v1185_v1 = vpop.eup %1184  ;;  %v723_v2 = vadd.f32 1.0, %v1183_v56  ;;  %v627_v3 = vmul.f32 0.7978846, %v577_v51  ;;  %v429_v6 = vmul.f32 %v1628_v52, %v1628_v52  ;;  %v455_v7 = vmul.f32 %v1631_v55, %v1631_v55 }
 0x11b   :  { %v749_v8 = vadd.f32 1.0, %v1185_v1  ;;  %v653_v13 = vmul.f32 0.7978846, %v603_v57  ;;  %v528_v14 = vmul.f32 0.044715, %v478_v59  ;;  %v251_v19 = vpop.f32.mrf.mxu0 }
 0x11c   :  { %v355_v20 = vpop.f32.mrf.mxu1  ;;  %v773_v25 = vmul.f32 0.5, %v723_v2  ;;  %1198 = vtanh.f32 %v627_v3  ;;  %v554_v31 = vmul.f32 0.044715, %v504_v60  ;;  %v479_v39 = vmul.f32 %v429_v6, %v1628_v52 }
 0x11d   :  { %v1187_v40 = vpop.eup %1186  ;;  %v799_v42 = vmul.f32 0.5, %v749_v8  ;;  %1200 = vtanh.f32 %v653_v13  ;;  %v578_v43 = vadd.f32 %v528_v14, %v1616_v26  ;;  %v505_v46 = vmul.f32 %v455_v7, %v1631_v55  ;;  %v1064_v47 = vpop.f32.mrf.mxu0 }
 0x11e   :  { %v1116_v0 = vpop.f32.mrf.mxu1  ;;  %v1189_v48 = vpop.eup %1188  ;;  %v823_v49 = vmul.f32 %v773_v25, %v1549_v44  ;;  %v724_v50 = vadd.f32 1.0, %v1187_v40  ;;  %v604_v51 = vadd.f32 %v554_v31, %v1620_v32  ;;  %v529_v56 = vmul.f32 0.044715, %v479_v39 }
 0x11f   :  { %v849_v57 = vmul.f32 %v799_v42, %v1552_v45  ;;  %v750_v59 = vadd.f32 1.0, %v1189_v48  ;;  %v628_v60 = vmul.f32 0.7978846, %v578_v43  ;;  %v555_v62 = vmul.f32 0.044715, %v505_v46  ;;  %v256_v63 = vpop.f32.mrf.mxu0 }
 0x120   :  { %v360_v1 = vpop.f32.mrf.mxu1  ;;  %v873_v2 = vadd.f32 %v823_v49, %v1435_v9  ;;  %v774_v3 = vmul.f32 0.5, %v724_v50  ;;  %v654_v6 = vmul.f32 0.7978846, %v604_v51  ;;  %v579_v7 = vadd.f32 %v529_v56, %v1628_v52 }
 0x121   :  { %v899_v8 = vadd.f32 %v849_v57, %v1439_v11  ;;  %v800_v44 = vmul.f32 0.5, %v750_v59  ;;  %1202 = vtanh.f32 %v628_v60  ;;  %v605_v13 = vadd.f32 %v555_v62, %v1631_v55  ;;  %v1067_v14 = vpop.f32.mrf.mxu0 }
 0x122   :  { %v1119_v25 = vpop.f32.mrf.mxu1  ;;  %v1191_v45 = vpop.eup %1190  ;;  %923 = vst [vmem:[#allocation7] sm:$0xff] %v873_v2  ;;  %v824_v31 = vmul.f32 %v774_v3, %v1561_v53  ;;  %1204 = vtanh.f32 %v654_v6  ;;  %v629_v39 = vmul.f32 0.7978846, %v579_v7  ;;  %v1652_v9 = vadd.f32 %v1546_v41, %v251_v19 }
 0x123   :  { %v1193_v40 = vpop.eup %1192  ;;  %949 = vst [vmem:[#allocation7 + $0xd0] sm:$0xff] %v899_v8  ;;  %v850_v42 = vmul.f32 %v800_v44, %v1564_v54  ;;  %v725_v11 = vadd.f32 1.0, %v1191_v45  ;;  %v655_v43 = vmul.f32 0.7978846, %v605_v13  ;;  %v1656_v46 = vadd.f32 %v1546_v41, %v355_v20  ;;  %v1658_v47 = vpop.f32.mrf.mxu0 }
 0x124   :  { %v1660_v0 = vpop.f32.mrf.mxu1  ;;  %v874_v53 = vadd.f32 %v824_v31, %v1437_v10  ;;  %v751_v48 = vadd.f32 1.0, %v1193_v40  ;;  %1206 = vtanh.f32 %v629_v39  ;;  %v430_v19 = vmul.f32 %v1652_v9, %v1652_v9 }
 0x125   :  { %v1195_v49 = vpop.eup %1194  ;;  %v900_v50 = vadd.f32 %v850_v42, %v1441_v12  ;;  %v775_v54 = vmul.f32 0.5, %v725_v11  ;;  %1208 = vtanh.f32 %v655_v43  ;;  %v456_v20 = vmul.f32 %v1656_v46, %v1656_v46  ;;  %v1068_v51 = vpop.f32.mrf.mxu0 }
 0x126   :  { %v1120_v56 = vpop.f32.mrf.mxu1  ;;  %v1197_v57 = vpop.eup %1196  ;;  %924 = vst [vmem:[#allocation7 + $0x8] sm:$0xff] %v874_v53  ;;  %v801_v59 = vmul.f32 0.5, %v751_v48  ;;  %v726_v60 = vadd.f32 1.0, %v1195_v49  ;;  %v480_v10 = vmul.f32 %v430_v19, %v1652_v9  ;;  %v1670_v62 = vadd.f32 %v1546_v41, %v256_v63 }
 0x127   :  { %950 = vst [vmem:[#allocation7 + $0xd8] sm:$0xff] %v900_v50  ;;  %v825_v2 = vmul.f32 %v775_v54, %v1575_v4  ;;  %v752_v12 = vadd.f32 1.0, %v1197_v57  ;;  %v506_v3 = vmul.f32 %v456_v20, %v1656_v46  ;;  %v1675_v6 = vadd.f32 %v1546_v41, %v360_v1  ;;  %v1677_v7 = vpop.f32.mrf.mxu0 }
 0x128   :  { %v1679_v8 = vpop.f32.mrf.mxu1  ;;  %v851_v44 = vmul.f32 %v801_v59, %v1578_v5  ;;  %v776_v13 = vmul.f32 0.5, %v726_v60  ;;  %v530_v14 = vmul.f32 0.044715, %v480_v10  ;;  %v431_v63 = vmul.f32 %v1670_v62, %v1670_v62 }
 0x129   :  { %v1199_v25 = vpop.eup %1198  ;;  %v875_v4 = vadd.f32 %v825_v2, %v1449_v15  ;;  %v802_v45 = vmul.f32 0.5, %v752_v12  ;;  %v556_v31 = vmul.f32 0.044715, %v506_v3  ;;  %v457_v1 = vmul.f32 %v1675_v6, %v1675_v6  ;;  %v1071_v39 = vpop.f32.mrf.mxu0 }
 0x12a   :  { %v1123_v40 = vpop.f32.mrf.mxu1  ;;  %v1201_v42 = vpop.eup %1200  ;;  %v901_v11 = vadd.f32 %v851_v44, %v1457_v17  ;;  %v826_v5 = vmul.f32 %v776_v13, %v1586_v37  ;;  %v727_v43 = vadd.f32 1.0, %v1199_v25  ;;  %v580_v53 = vadd.f32 %v530_v14, %v1652_v9 }
 0x12b   :  { %925 = vst [vmem:[#allocation7 + $0x10] sm:$0xff] %v875_v4  ;;  %v852_v48 = vmul.f32 %v802_v45, %v1589_v38  ;;  %v753_v19 = vadd.f32 1.0, %v1201_v42  ;;  %v606_v15 = vadd.f32 %v556_v31, %v1656_v46  ;;  %v481_v49 = vmul.f32 %v431_v63, %v1670_v62  ;;  %v1693_v50 = vpop.f32.mrf.mxu0 }
 0x12c   :  { %v1695_v54 = vpop.f32.mrf.mxu1  ;;  %951 = vst [vmem:[#allocation7 + $0xe0] sm:$0xff] %v901_v11  ;;  %v876_v17 = vadd.f32 %v826_v5, %v1455_v16  ;;  %v777_v20 = vmul.f32 0.5, %v727_v43  ;;  %v630_v37 = vmul.f32 0.7978846, %v580_v53  ;;  %v507_v51 = vmul.f32 %v457_v1, %v1675_v6 }
 0x12d   :  { %v902_v56 = vadd.f32 %v852_v48, %v1459_v18  ;;  %v803_v57 = vmul.f32 0.5, %v753_v19  ;;  %v656_v38 = vmul.f32 0.7978846, %v606_v15  ;;  %v531_v59 = vmul.f32 0.044715, %v481_v49  ;;  %v1072_v60 = vpop.f32.mrf.mxu0 }
 0x12e   :  { %v1124_v10 = vpop.f32.mrf.mxu1  ;;  %v1203_v2 = vpop.eup %1202  ;;  %926 = vst [vmem:[#allocation7 + $0x18] sm:$0xff] %v876_v17  ;;  %v827_v12 = vmul.f32 %v777_v20, %v1601_v58  ;;  %1210 = vtanh.f32 %v630_v37  ;;  %v557_v3 = vmul.f32 0.044715, %v507_v51  ;;  %v1703_v16 = vadd.f32 %v1546_v41, %v1658_v47 }
 0x12f   :  { %v1205_v44 = vpop.eup %1204  ;;  %952 = vst [vmem:[#allocation7 + $0xe8] sm:$0xff] %v902_v56  ;;  %v853_v13 = vmul.f32 %v803_v57, %v1606_v61  ;;  %v728_v18 = vadd.f32 1.0, %v1203_v2  ;;  %1212 = vtanh.f32 %v656_v38  ;;  %v581_v14 = vadd.f32 %v531_v59, %v1670_v62  ;;  %v272_v63 = vpop.f32.mrf.mxu0 }
 0x130   :  { %v1707_v25 = vpop.f32.mrf.mxu1  ;;  %v877_v4 = vadd.f32 %v827_v12, %v1465_v21  ;;  %v754_v58 = vadd.f32 1.0, %v1205_v44  ;;  %v607_v45 = vadd.f32 %v557_v3, %v1675_v6  ;;  %v432_v47 = vmul.f32 %v1703_v16, %v1703_v16 }
 0x131   :  { %v1207_v31 = vpop.eup %1206  ;;  %v903_v1 = vadd.f32 %v853_v13, %v1473_v23  ;;  %v778_v39 = vmul.f32 0.5, %v728_v18  ;;  %v631_v61 = vmul.f32 0.7978846, %v581_v14  ;;  %v1716_v40 = vadd.f32 %v1546_v41, %v1660_v0  ;;  %v1075_v42 = vpop.f32.mrf.mxu0 }
 0x132   :  { %v1127_v11 = vpop.f32.mrf.mxu1  ;;  %v1209_v5 = vpop.eup %1208  ;;  %927 = vst [vmem:[#allocation7 + $0x20] sm:$0xff] %v877_v4  ;;  %v804_v21 = vmul.f32 0.5, %v754_v58  ;;  %v729_v43 = vadd.f32 1.0, %v1207_v31  ;;  %v657_v53 = vmul.f32 0.7978846, %v607_v45  ;;  %v482_v48 = vmul.f32 %v432_v47, %v1703_v16 }
 0x133   :  { %953 = vst [vmem:[#allocation7 + $0xf0] sm:$0xff] %v903_v1  ;;  %v828_v19 = vmul.f32 %v778_v39, %v1616_v26  ;;  %v755_v15 = vadd.f32 1.0, %v1209_v5  ;;  %1214 = vtanh.f32 %v631_v61  ;;  %v458_v23 = vmul.f32 %v1716_v40, %v1716_v40  ;;  %v1722_v49 = vpop.f32.mrf.mxu0 }
 0x134   :  { %v1724_v0 = vpop.f32.mrf.mxu1  ;;  %v854_v17 = vmul.f32 %v804_v21, %v1620_v32  ;;  %v779_v20 = vmul.f32 0.5, %v729_v43  ;;  %1216 = vtanh.f32 %v657_v53  ;;  %v532_v37 = vmul.f32 0.044715, %v482_v48 }
 0x135   :  { %v878_v51 = vadd.f32 %v828_v19, %v1471_v22  ;;  %v805_v56 = vmul.f32 0.5, %v755_v15  ;;  %v508_v57 = vmul.f32 %v458_v23, %v1716_v40  ;;  %v1731_v26 = vadd.f32 %v1546_v41, %v1677_v7  ;;  %v1076_v38 = vpop.f32.mrf.mxu0 }
 0x136   :  { %v1128_v59 = vpop.f32.mrf.mxu1  ;;  %v904_v60 = vadd.f32 %v854_v17, %v1475_v24  ;;  %v829_v10 = vmul.f32 %v779_v20, %v1628_v52  ;;  %v582_v32 = vadd.f32 %v532_v37, %v1703_v16  ;;  %v1738_v2 = vadd.f32 %v1546_v41, %v1679_v8 }
 0x137   :  { %928 = vst [vmem:[#allocation7 + $0x28] sm:$0xff] %v878_v51  ;;  %v855_v22 = vmul.f32 %v805_v56, %v1631_v55  ;;  %v558_v12 = vmul.f32 0.044715, %v508_v57  ;;  %v433_v7 = vmul.f32 %v1731_v26, %v1731_v26  ;;  %v1745_v3 = vadd.f32 %v1546_v41, %v1693_v50  ;;  %v1747_v24 = vpop.f32.mrf.mxu0 }
 0x138   :  { %v1749_v52 = vpop.f32.mrf.mxu1  ;;  %954 = vst [vmem:[#allocation7 + $0xf8] sm:$0xff] %v904_v60  ;;  %v879_v44 = vadd.f32 %v829_v10, %v1481_v27  ;;  %v632_v8 = vmul.f32 0.7978846, %v582_v32  ;;  %v459_v13 = vmul.f32 %v1738_v2, %v1738_v2  ;;  %v1756_v55 = vadd.f32 %v1546_v41, %v1695_v54 }
 0x139   :  { %v905_v18 = vadd.f32 %v855_v22, %v1489_v29  ;;  %v608_v50 = vadd.f32 %v558_v12, %v1716_v40  ;;  %v483_v14 = vmul.f32 %v433_v7, %v1731_v26  ;;  %v434_v4 = vmul.f32 %v1745_v3, %v1745_v3  ;;  %v1079_v58 = vpop.f32.mrf.mxu0 }
 0x13a   :  { %v1131_v45 = vpop.f32.mrf.mxu1  ;;  %929 = vst [vmem:[#allocation7 + $0x30] sm:$0xff] %v879_v44  ;;  %1218 = vtanh.f32 %v632_v8  ;;  %v509_v27 = vmul.f32 %v459_v13, %v1738_v2  ;;  %v460_v47 = vmul.f32 %v1756_v55, %v1756_v55  ;;  %v1767_v54 = vadd.f32 %v1546_v41, %v272_v63 }
 0x13b   :  { %v1211_v29 = vpop.eup %1210  ;;  %955 = vst [vmem:[#allocation7 + $0x100] sm:$0xff] %v905_v18  ;;  %v658_v31 = vmul.f32 0.7978846, %v608_v50  ;;  %v533_v1 = vmul.f32 0.044715, %v483_v14  ;;  %v484_v39 = vmul.f32 %v434_v4, %v1745_v3  ;;  %v1772_v61 = vadd.f32 %v1546_v41, %v1707_v25  ;;  %v1774_v42 = vpop.f32.mrf.mxu0 }
 0x13c   :  { %v1776_v11 = vpop.f32.mrf.mxu1  ;;  %v1213_v5 = vpop.eup %1212  ;;  %v730_v21 = vadd.f32 1.0, %v1211_v29  ;;  %v559_v43 = vmul.f32 0.044715, %v509_v27  ;;  %v510_v63 = vmul.f32 %v460_v47, %v1756_v55  ;;  %v435_v53 = vmul.f32 %v1767_v54, %v1767_v54 }
 0x13d   :  { %v756_v48 = vadd.f32 1.0, %v1213_v5  ;;  %1220 = vtanh.f32 %v658_v31  ;;  %v583_v19 = vadd.f32 %v533_v1, %v1731_v26  ;;  %v534_v15 = vmul.f32 0.044715, %v484_v39  ;;  %v1080_v23 = vpop.f32.mrf.mxu0 }
 0x13e   :  { %v1132_v25 = vpop.f32.mrf.mxu1  ;;  %v780_v17 = vmul.f32 0.5, %v730_v21  ;;  %v609_v20 = vadd.f32 %v559_v43, %v1738_v2  ;;  %v560_v37 = vmul.f32 0.044715, %v510_v63  ;;  %v485_v51 = vmul.f32 %v435_v53, %v1767_v54 }
 0x13f   :  { %v806_v56 = vmul.f32 0.5, %v756_v48  ;;  %v633_v57 = vmul.f32 0.7978846, %v583_v19  ;;  %v584_v38 = vadd.f32 %v534_v15, %v1745_v3  ;;  %v461_v59 = vmul.f32 %v1772_v61, %v1772_v61  ;;  %v1787_v60 = vpop.f32.mrf.mxu0 }
 0x140   :  { %v1789_v10 = vpop.f32.mrf.mxu1  ;;  %v1215_v32 = vpop.eup %1214  ;;  %v830_v22 = vmul.f32 %v780_v17, %v1652_v9  ;;  %v659_v12 = vmul.f32 0.7978846, %v609_v20  ;;  %v610_v7 = vadd.f32 %v560_v37, %v1756_v55  ;;  %v535_v44 = vmul.f32 0.044715, %v485_v51 }
 0x141   :  { %v1217_v8 = vpop.eup %1216  ;;  %v856_v13 = vmul.f32 %v806_v56, %v1656_v46  ;;  %v731_v18 = vadd.f32 1.0, %v1215_v32  ;;  %1222 = vtanh.f32 %v633_v57  ;;  %v634_v50 = vmul.f32 0.7978846, %v584_v38  ;;  %v1083_v14 = vpop.f32.mrf.mxu0 }
 0x142   :  { %v1135_v4 = vpop.f32.mrf.mxu1  ;;  %v880_v58 = vadd.f32 %v830_v22, %v1487_v28  ;;  %v757_v45 = vadd.f32 1.0, %v1217_v8  ;;  %1224 = vtanh.f32 %v659_v12  ;;  %v660_v27 = vmul.f32 0.7978846, %v610_v7 }
 0x143   :  { %v906_v47 = vadd.f32 %v856_v13, %v1491_v30  ;;  %v781_v9 = vmul.f32 0.5, %v731_v18  ;;  %1226 = vtanh.f32 %v634_v50  ;;  %v585_v29 = vadd.f32 %v535_v44, %v1767_v54  ;;  %v1797_v31 = vpop.f32.mrf.mxu0 }
 0x144   :  { %v1799_v1 = vpop.f32.mrf.mxu1  ;;  %930 = vst [vmem:[#allocation7 + $0x38] sm:$0xff] %v880_v58  ;;  %v807_v46 = vmul.f32 0.5, %v757_v45  ;;  %1228 = vtanh.f32 %v660_v27  ;;  %v511_v39 = vmul.f32 %v461_v59, %v1772_v61  ;;  %v1804_v28 = vadd.f32 %v1546_v41, %v1722_v49 }
 0x145   :  { %956 = vst [vmem:[#allocation7 + $0x108] sm:$0xff] %v906_v47  ;;  %v831_v30 = vmul.f32 %v781_v9, %v1670_v62  ;;  %v635_v5 = vmul.f32 0.7978846, %v585_v29  ;;  %v1809_v21 = vadd.f32 %v1546_v41, %v1724_v0  ;;  %v1813_v43 = vadd.f32 %v1546_v41, %v1747_v24  ;;  %v1084_v63 = vpop.f32.mrf.mxu0 }
 0x146   :  { %v1136_v53 = vpop.f32.mrf.mxu1  ;;  %v857_v48 = vmul.f32 %v807_v46, %v1675_v6  ;;  %v561_v19 = vmul.f32 0.044715, %v511_v39  ;;  %v436_v49 = vmul.f32 %v1804_v28, %v1804_v28  ;;  %v1820_v62 = vadd.f32 %v1546_v41, %v1749_v52 }
 0x147   :  { %v1219_v15 = vpop.eup %1218  ;;  %v881_v0 = vadd.f32 %v831_v30, %v1497_v33  ;;  %1230 = vtanh.f32 %v635_v5  ;;  %v462_v24 = vmul.f32 %v1809_v21, %v1809_v21  ;;  %v437_v23 = vmul.f32 %v1813_v43, %v1813_v43  ;;  %v1827_v25 = vpop.f32.mrf.mxu0 }
 0x148   :  { %v1829_v6 = vpop.f32.mrf.mxu1  ;;  %v907_v17 = vadd.f32 %v857_v48, %v1505_v35  ;;  %v732_v20 = vadd.f32 1.0, %v1219_v15  ;;  %v611_v52 = vadd.f32 %v561_v19, %v1772_v61  ;;  %v486_v37 = vmul.f32 %v436_v49, %v1804_v28 }
 0x149   :  { %931 = vst [vmem:[#allocation7 + $0x40] sm:$0xff] %v881_v0  ;;  %v512_v33 = vmul.f32 %v462_v24, %v1809_v21  ;;  %v487_v51 = vmul.f32 %v437_v23, %v1813_v43  ;;  %v463_v56 = vmul.f32 %v1820_v62, %v1820_v62  ;;  %v1840_v57 = vadd.f32 %v1546_v41, %v1774_v42  ;;  %v1087_v38 = vpop.f32.mrf.mxu0 }
 0x14a   :  { %v1139_v59 = vpop.f32.mrf.mxu1  ;;  %v1221_v35 = vpop.eup %1220  ;;  %957 = vst [vmem:[#allocation7 + $0x110] sm:$0xff] %v907_v17  ;;  %v782_v32 = vmul.f32 0.5, %v732_v20  ;;  %v661_v22 = vmul.f32 0.7978846, %v611_v52  ;;  %v536_v12 = vmul.f32 0.044715, %v486_v37  ;;  %v1844_v7 = vadd.f32 %v1546_v41, %v1776_v11 }
 0x14b   :  { %v758_v44 = vadd.f32 1.0, %v1221_v35  ;;  %v562_v8 = vmul.f32 0.044715, %v512_v33  ;;  %v537_v13 = vmul.f32 0.044715, %v487_v51  ;;  %v513_v18 = vmul.f32 %v463_v56, %v1820_v62  ;;  %v1847_v50 = vpop.f32.mrf.mxu0 }
 0x14c   :  { %v1849_v42 = vpop.f32.mrf.mxu1  ;;  %v832_v14 = vmul.f32 %v782_v32, %v1703_v16  ;;  %1232 = vtanh.f32 %v661_v22  ;;  %v586_v4 = vadd.f32 %v536_v12, %v1804_v28  ;;  %v438_v58 = vmul.f32 %v1840_v57, %v1840_v57 }
 0x14d   :  { %v808_v45 = vmul.f32 0.5, %v758_v44  ;;  %v612_v11 = vadd.f32 %v562_v8, %v1809_v21  ;;  %v587_v27 = vadd.f32 %v537_v13, %v1813_v43  ;;  %v563_v47 = vmul.f32 0.044715, %v513_v18  ;;  %v1088_v9 = vpop.f32.mrf.mxu0 }
 0x14e   :  { %v1140_v29 = vpop.f32.mrf.mxu1  ;;  %v1223_v46 = vpop.eup %1222  ;;  %v882_v39 = vadd.f32 %v832_v14, %v1503_v34  ;;  %v636_v30 = vmul.f32 0.7978846, %v586_v4  ;;  %v488_v16 = vmul.f32 %v438_v58, %v1840_v57  ;;  %v464_v5 = vmul.f32 %v1844_v7, %v1844_v7  ;;  %v1282_v4 = vld [vmem:[#allocation2 + $0x50] sm:$0xff]  ;;  %v1283_v9 = vld [vmem:[#allocation2 + $0x120] sm:$0xff] }
 0x14f   :  { %v1225_v63 = vpop.eup %1224  ;;  %v858_v53 = vmul.f32 %v808_v45, %v1716_v40  ;;  %v733_v48 = vadd.f32 1.0, %v1223_v46  ;;  %v662_v19 = vmul.f32 0.7978846, %v612_v11  ;;  %v637_v49 = vmul.f32 0.7978846, %v587_v27  ;;  %v1862_v15 = vpop.f32.mrf.mxu0 }
 0x150   :  { %v1864_v0 = vpop.f32.mrf.mxu1  ;;  %v1227_v24 = vpop.eup %1226  ;;  %932 = vst [vmem:[#allocation7 + $0x48] sm:$0xff] %v882_v39  ;;  %v759_v23 = vadd.f32 1.0, %v1225_v63  ;;  %1234 = vtanh.f32 %v636_v30  ;;  %v613_v34 = vadd.f32 %v563_v47, %v1820_v62  ;;  %v538_v17 = vmul.f32 0.044715, %v488_v16  ;;  %v1284_v30 = vld [vmem:[#allocation2 + $0x58] sm:$0xff] }
 0x151   :  { %v1229_v20 = vpop.eup %1228  ;;  %v908_v52 = vadd.f32 %v858_v53, %v1507_v36  ;;  %v783_v37 = vmul.f32 0.5, %v733_v48  ;;  %v734_v33 = vadd.f32 1.0, %v1227_v24  ;;  %1236 = vtanh.f32 %v662_v19  ;;  %v1091_v40 = vpop.f32.mrf.mxu0  ;;  %v1285_v53 = vld [vmem:[#allocation2 + $0x128] sm:$0xff] }
 0x152   :  { %v1143_v51 = vpop.f32.mrf.mxu1  ;;  %v809_v56 = vmul.f32 0.5, %v759_v23  ;;  %v760_v38 = vadd.f32 1.0, %v1229_v20  ;;  %1238 = vtanh.f32 %v637_v49  ;;  %v663_v59 = vmul.f32 0.7978846, %v613_v34  ;;  %v1286_v40 = vld [vmem:[#allocation2 + $0x60] sm:$0xff] }
 0x153   :  { %958 = vst [vmem:[#allocation7 + $0x118] sm:$0xff] %v908_v52  ;;  %v833_v35 = vmul.f32 %v783_v37, %v1731_v26  ;;  %v784_v32 = vmul.f32 0.5, %v734_v33  ;;  %v588_v22 = vadd.f32 %v538_v17, %v1840_v57  ;;  %v514_v12 = vmul.f32 %v464_v5, %v1844_v7  ;;  %v1871_v44 = vpop.f32.mrf.mxu0 }
 0x154   :  { %v1873_v36 = vpop.f32.mrf.mxu1  ;;  %v1231_v8 = vpop.eup %1230  ;;  %v859_v13 = vmul.f32 %v809_v56, %v1738_v2  ;;  %v810_v18 = vmul.f32 0.5, %v760_v38  ;;  %1240 = vtanh.f32 %v663_v59  ;;  %v1878_v14 = vadd.f32 %v1546_v41, %v1787_v60 }
 0x155   :  { %v883_v26 = vadd.f32 %v1282_v4, %v833_v35  ;;  %v834_v58 = vmul.f32 %v784_v32, %v1745_v3  ;;  %v735_v45 = vadd.f32 1.0, %v1231_v8  ;;  %v638_v11 = vmul.f32 0.7978846, %v588_v22  ;;  %v1092_v27 = vpop.f32.mrf.mxu0 }
 0x156   :  { %v1144_v47 = vpop.f32.mrf.mxu1  ;;  %v909_v29 = vadd.f32 %v1283_v9, %v859_v13  ;;  %v860_v46 = vmul.f32 %v810_v18, %v1756_v55  ;;  %v564_v39 = vmul.f32 0.044715, %v514_v12  ;;  %v439_v2 = vmul.f32 %v1878_v14, %v1878_v14 }
 0x157   :  { %933 = vst [vmem:[#allocation7 + $0x50] sm:$0xff] %v883_v26  ;;  %v884_v60 = vadd.f32 %v1284_v30, %v834_v58  ;;  %v785_v16 = vmul.f32 0.5, %v735_v45  ;;  %1242 = vtanh.f32 %v638_v11  ;;  %v1886_v3 = vadd.f32 %v1546_v41, %v1789_v10  ;;  %v1888_v5 = vpop.f32.mrf.mxu0 }
 0x158   :  { %v1890_v63 = vpop.f32.mrf.mxu1  ;;  %959 = vst [vmem:[#allocation7 + $0x120] sm:$0xff] %v909_v29  ;;  %v910_v55 = vadd.f32 %v1285_v53, %v860_v46  ;;  %v614_v48 = vadd.f32 %v564_v39, %v1844_v7  ;;  %v489_v19 = vmul.f32 %v439_v2, %v1878_v14  ;;  %v1896_v49 = vadd.f32 %v1546_v41, %v1797_v31 }
 0x159   :  { %v1233_v24 = vpop.eup %1232  ;;  %934 = vst [vmem:[#allocation7 + $0x58] sm:$0xff] %v884_v60  ;;  %v835_v10 = vmul.f32 %v785_v16, %v1767_v54  ;;  %v465_v23 = vmul.f32 %v1886_v3, %v1886_v3  ;;  %v1903_v34 = vadd.f32 %v1546_v41, %v1799_v1  ;;  %v1907_v17 = vadd.f32 %v1546_v41, %v1827_v25  ;;  %v1095_v20 = vpop.f32.mrf.mxu0  ;;  %v1287_v16 = vld [vmem:[#allocation2 + $0x130] sm:$0xff] }
 0x15a   :  { %v1147_v52 = vpop.f32.mrf.mxu1  ;;  %960 = vst [vmem:[#allocation7 + $0x128] sm:$0xff] %v910_v55  ;;  %v761_v31 = vadd.f32 1.0, %v1233_v24  ;;  %v664_v37 = vmul.f32 0.7978846, %v614_v48  ;;  %v539_v33 = vmul.f32 0.044715, %v489_v19  ;;  %v440_v54 = vmul.f32 %v1896_v49, %v1896_v49 }
 0x15b   :  { %v885_v51 = vadd.f32 %v1286_v40, %v835_v10  ;;  %v515_v56 = vmul.f32 %v465_v23, %v1886_v3  ;;  %v466_v1 = vmul.f32 %v1903_v34, %v1903_v34  ;;  %v441_v25 = vmul.f32 %v1907_v17, %v1907_v17  ;;  %v1916_v38 = vpop.f32.mrf.mxu0 }
 0x15c   :  { %v1918_v59 = vpop.f32.mrf.mxu1  ;;  %v811_v35 = vmul.f32 0.5, %v761_v31  ;;  %1244 = vtanh.f32 %v664_v37  ;;  %v589_v32 = vadd.f32 %v539_v33, %v1878_v14  ;;  %v490_v22 = vmul.f32 %v440_v54, %v1896_v49 }
 0x15d   :  { %v1235_v12 = vpop.eup %1234  ;;  %935 = vst [vmem:[#allocation7 + $0x60] sm:$0xff] %v885_v51  ;;  %v565_v8 = vmul.f32 0.044715, %v515_v56  ;;  %v516_v13 = vmul.f32 %v466_v1, %v1903_v34  ;;  %v491_v18 = vmul.f32 %v441_v25, %v1907_v17  ;;  %v1926_v4 = vadd.f32 %v1546_v41, %v1829_v6  ;;  %v1096_v26 = vpop.f32.mrf.mxu0  ;;  %v1288_v56 = vld [vmem:[#allocation2 + $0x68] sm:$0xff] }
 0x15e   :  { %v1148_v58 = vpop.f32.mrf.mxu1  ;;  %v1237_v45 = vpop.eup %1236  ;;  %v861_v11 = vmul.f32 %v811_v35, %v1772_v61  ;;  %v736_v27 = vadd.f32 1.0, %v1235_v12  ;;  %v639_v47 = vmul.f32 0.7978846, %v589_v32  ;;  %v540_v9 = vmul.f32 0.044715, %v490_v22  ;;  %v1289_v22 = vld [vmem:[#allocation2 + $0x138] sm:$0xff] }
 0x15f   :  { %v1239_v29 = vpop.eup %1238  ;;  %v762_v46 = vadd.f32 1.0, %v1237_v45  ;;  %v615_v39 = vadd.f32 %v565_v8, %v1886_v3  ;;  %v566_v2 = vmul.f32 0.044715, %v516_v13  ;;  %v541_v30 = vmul.f32 0.044715, %v491_v18  ;;  %v1930_v60 = vpop.f32.mrf.mxu0  ;;  %v1290_v13 = vld [vmem:[#allocation2 + $0x70] sm:$0xff] }
 0x160   :  { %v911_v53 = vadd.f32 %v1287_v16, %v861_v11  ;;  %v786_v41 = vmul.f32 0.5, %v736_v27  ;;  %v737_v6 = vadd.f32 1.0, %v1239_v29  ;;  %1246 = vtanh.f32 %v639_v47 }
 0x161   :  { %v1241_v55 = vpop.eup %1240  ;;  %v812_v48 = vmul.f32 0.5, %v762_v46  ;;  %v665_v19 = vmul.f32 0.7978846, %v615_v39  ;;  %v590_v61 = vadd.f32 %v540_v9, %v1896_v49  ;;  %v616_v24 = vadd.f32 %v566_v2, %v1903_v34  ;;  %v1099_v10 = vpop.f32.mrf.mxu0 }
 0x162   :  { %961 = vst [vmem:[#allocation7 + $0x130] sm:$0xff] %v911_v53  ;;  %v836_v23 = vmul.f32 %v786_v41, %v1804_v28  ;;  %v787_v20 = vmul.f32 0.5, %v737_v6  ;;  %v763_v52 = vadd.f32 1.0, %v1241_v55  ;;  %v591_v31 = vadd.f32 %v541_v30, %v1907_v17  ;;  %v1293_v41 = vld [vmem:[#allocation2 + $0x78] sm:$0xff] }
 0x163   :  { %v862_v37 = vmul.f32 %v812_v48, %v1809_v21  ;;  %1248 = vtanh.f32 %v665_v19  ;;  %v640_v33 = vmul.f32 0.7978846, %v590_v61  ;;  %v666_v54 = vmul.f32 0.7978846, %v616_v24  ;;  %v1937_v40 = vpop.f32.mrf.mxu0 }
 0x164   :  { %v1243_v51 = vpop.eup %1242  ;;  %v886_v1 = vadd.f32 %v1288_v56, %v836_v23  ;;  %v837_v25 = vmul.f32 %v787_v20, %v1813_v43  ;;  %v813_v35 = vmul.f32 0.5, %v763_v52  ;;  %v641_v32 = vmul.f32 0.7978846, %v591_v31  ;;  %v1946_v43 = vld [vmem:[%s2074_s2] ss:$0 sm:$0xff]  ;;  %s1387_s2 = smov [#allocation7]  }
 0x165   :  { %v912_v28 = vadd.f32 %v1289_v22, %v862_v37  ;;  %v738_v12 = vadd.f32 1.0, %v1243_v51  ;;  %1250 = vtanh.f32 %v640_v33  ;;  %v467_v8 = vmul.f32 %v1926_v4, %v1926_v4  ;;  %v1100_v21 = vpop.f32.mrf.mxu0  ;;  %s978_s28 = sshll.u32 %s1387_s2, 4  ;;  %s979_s28 = int_to_ptr.vmem [resolvable:$true] %s978_s28 }
 0x166   :  { %936 = vst [vmem:[#allocation7 + $0x68] sm:$0xff] %v886_v1  ;;  %v887_v18 = vadd.f32 %v1290_v13, %v837_v25  ;;  %v863_v26 = vmul.f32 %v813_v35, %v1820_v62  ;;  %1252 = vtanh.f32 %v666_v54  ;;  %v1950_v58 = vadd.f32 %v1946_v43, %v1847_v50  ;;  %v1292_v62 = vld [vmem:[#allocation2 + $0x140] sm:$0xff]  ;;  %s1353_s29 = scalar_lea.vmem %s979_s28, 6400  ;;  %p1358_p11 = scmp.lt.s32.totalorder %s979_s28, %s979_s28 }
 0x167   :  { %962 = vst [vmem:[#allocation7 + $0x138] sm:$0xff] %v912_v28  ;;  %v788_v45 = vmul.f32 0.5, %v738_v12  ;;  %1254 = vtanh.f32 %v641_v32  ;;  %v517_v11 = vmul.f32 %v467_v8, %v1926_v4  ;;  %v1955_v27 = vadd.f32 %v1946_v43, %v1849_v42  ;;  %v1294_v32 = vld [vmem:[#allocation2 + $0x148] sm:$0xff]  ;;  %p1354_p10 = scmp.ne.s32.totalorder %s979_s28, %s1353_s29  ;;  %p1359_p12 = scmp.lt.s32.totalorder %s1353_s29, %s1353_s29 }
 0x168   :  { %937 = vst [vmem:[#allocation7 + $0x70] sm:$0xff] %v887_v18  ;;  %v913_v47 = vadd.f32 %v1292_v62, %v863_v26  ;;  %v442_v9 = vmul.f32 %v1950_v58, %v1950_v58  ;;  %v1961_v29 = vadd.f32 %v1946_v43, %v1862_v15  ;;  %v1965_v50 = vadd.f32 %v1946_v43, %v1864_v0 }
 0x169   :  { %v1245_v46 = vpop.eup %1244  ;;  %v838_v39 = vmul.f32 %v788_v45, %v1840_v57  ;;  %v567_v2 = vmul.f32 0.044715, %v517_v11  ;;  %v468_v42 = vmul.f32 %v1955_v27, %v1955_v27  ;;  %v1972_v30 = vadd.f32 %v1946_v43, %v1871_v44  ;;  %p1360_p13 = por %p1359_p12, %p1358_p11 }
 0x16a   :  { %963 = vst [vmem:[#allocation7 + $0x140] sm:$0xff] %v913_v47  ;;  %v764_v16 = vadd.f32 1.0, %v1245_v46  ;;  %v492_v15 = vmul.f32 %v442_v9, %v1950_v58  ;;  %v443_v53 = vmul.f32 %v1961_v29, %v1961_v29  ;;  %v469_v0 = vmul.f32 %v1965_v50, %v1965_v50 }
 0x16b   :  { %v888_v57 = vadd.f32 %v1293_v41, %v838_v39  ;;  %v617_v6 = vadd.f32 %v567_v2, %v1926_v4  ;;  %v518_v55 = vmul.f32 %v468_v42, %v1955_v27  ;;  %v444_v44 = vmul.f32 %v1972_v30, %v1972_v30  ;;  %v1295_v2 = vld [vmem:[#allocation2 + $0x80] sm:$0xff]  ;;  %p1361_p0 = pnand %p1360_p13, %p1354_p10 }
 0x16c   :  { %v814_v48 = vmul.f32 0.5, %v764_v16  ;;  %v542_v19 = vmul.f32 0.044715, %v492_v15  ;;  %v493_v61 = vmul.f32 %v443_v53, %v1961_v29  ;;  %v519_v24 = vmul.f32 %v469_v0, %v1965_v50 }
 0x16d   :  { %v1247_v10 = vpop.eup %1246  ;;  %938 = vst [vmem:[#allocation7 + $0x78] sm:$0xff] %v888_v57  ;;  %v667_v23 = vmul.f32 0.7978846, %v617_v6  ;;  %v568_v20 = vmul.f32 0.044715, %v518_v55  ;;  %v494_v52 = vmul.f32 %v444_v44, %v1972_v30  ;;  %v1988_v31 = vadd.f32 %v1946_v43, %v1873_v36  ;;  %v1296_v55 = vld [vmem:[#allocation2 + $0x150] sm:$0xff] }
 0x16e   :  { %v864_v37 = vmul.f32 %v814_v48, %v1844_v7  ;;  %v739_v33 = vadd.f32 1.0, %v1247_v10  ;;  %v592_v54 = vadd.f32 %v542_v19, %v1950_v58  ;;  %v543_v51 = vmul.f32 0.044715, %v493_v61 }
 0x16f   :  { %1256 = vtanh.f32 %v667_v23  ;;  %v618_v56 = vadd.f32 %v568_v20, %v1955_v27  ;;  %v569_v1 = vmul.f32 0.044715, %v519_v24  ;;  %v544_v25 = vmul.f32 0.044715, %v494_v52 }
 0x170   :  { %v1249_v35 = vpop.eup %1248  ;;  %v914_v22 = vadd.f32 %v1294_v32, %v864_v37  ;;  %v789_v28 = vmul.f32 0.5, %v739_v33  ;;  %v642_v12 = vmul.f32 0.7978846, %v592_v54  ;;  %v593_v8 = vadd.f32 %v543_v51, %v1961_v29  ;;  %v1299_v51 = vld [vmem:[#allocation2 + $0x90] sm:$0xff] }
 0x171   :  { %v765_v36 = vadd.f32 1.0, %v1249_v35  ;;  %v668_v21 = vmul.f32 0.7978846, %v618_v56  ;;  %v619_v7 = vadd.f32 %v569_v1, %v1965_v50  ;;  %v594_v13 = vadd.f32 %v544_v25, %v1972_v30 }
 0x172   :  { %v1251_v18 = vpop.eup %1250  ;;  %964 = vst [vmem:[#allocation7 + $0x148] sm:$0xff] %v914_v22  ;;  %v839_v26 = vmul.f32 %v789_v28, %v1878_v14  ;;  %1258 = vtanh.f32 %v642_v12  ;;  %v643_v45 = vmul.f32 0.7978846, %v593_v8  ;;  %v470_v11 = vmul.f32 %v1988_v31, %v1988_v31 }
 0x173   :  { %v1253_v62 = vpop.eup %1252  ;;  %v815_v47 = vmul.f32 0.5, %v765_v36  ;;  %v740_v9 = vadd.f32 1.0, %v1251_v18  ;;  %1260 = vtanh.f32 %v668_v21  ;;  %v669_v46 = vmul.f32 0.7978846, %v619_v7 }
 0x174   :  { %v1255_v39 = vpop.eup %1254  ;;  %v889_v42 = vadd.f32 %v1295_v2, %v839_v26  ;;  %v766_v16 = vadd.f32 1.0, %v1253_v62  ;;  %1262 = vtanh.f32 %v643_v45  ;;  %v644_v15 = vmul.f32 0.7978846, %v594_v13 }
 0x175   :  { %v865_v53 = vmul.f32 %v815_v47, %v1886_v3  ;;  %v790_v0 = vmul.f32 0.5, %v740_v9  ;;  %v741_v14 = vadd.f32 1.0, %v1255_v39  ;;  %1264 = vtanh.f32 %v669_v46 }
 0x176   :  { %939 = vst [vmem:[#allocation7 + $0x80] sm:$0xff] %v889_v42  ;;  %v816_v41 = vmul.f32 0.5, %v766_v16  ;;  %1266 = vtanh.f32 %v644_v15  ;;  %v520_v57 = vmul.f32 %v470_v11, %v1988_v31  ;;  %v2003_v6 = vadd.f32 %v1946_v43, %v1888_v5  ;;  %v1297_v5 = vld [vmem:[#allocation2 + $0x88] sm:$0xff] }
 0x177   :  { %v915_v44 = vadd.f32 %v1296_v55, %v865_v53  ;;  %v840_v48 = vmul.f32 %v790_v0, %v1896_v49  ;;  %v791_v19 = vmul.f32 0.5, %v741_v14  ;;  %v2008_v3 = vadd.f32 %v1946_v43, %v1890_v63  ;;  %v1300_v55 = vld [vmem:[#allocation2 + $0x160] sm:$0xff] }
 0x178   :  { %v866_v61 = vmul.f32 %v816_v41, %v1903_v34  ;;  %v570_v24 = vmul.f32 0.044715, %v520_v57  ;;  %v445_v10 = vmul.f32 %v2003_v6, %v2003_v6  ;;  %v2015_v23 = vadd.f32 %v1946_v43, %v1916_v38  ;;  %v1298_v34 = vld [vmem:[#allocation2 + $0x158] sm:$0xff] }
 0x179   :  { %965 = vst [vmem:[#allocation7 + $0x150] sm:$0xff] %v915_v44  ;;  %v890_v20 = vadd.f32 %v1297_v5, %v840_v48  ;;  %v841_v49 = vmul.f32 %v791_v19, %v1907_v17  ;;  %v471_v52 = vmul.f32 %v2008_v3, %v2008_v3  ;;  %v2022_v63 = vadd.f32 %v1946_v43, %v1918_v59 }
 0x17a   :  { %v916_v37 = vadd.f32 %v1298_v34, %v866_v61  ;;  %v620_v33 = vadd.f32 %v570_v24, %v1988_v31  ;;  %v495_v54 = vmul.f32 %v445_v10, %v2003_v6  ;;  %v446_v38 = vmul.f32 %v2015_v23, %v2015_v23 }
 0x17b   :  { %940 = vst [vmem:[#allocation7 + $0x88] sm:$0xff] %v890_v20  ;;  %v891_v56 = vadd.f32 %v1299_v51, %v841_v49  ;;  %v521_v17 = vmul.f32 %v471_v52, %v2008_v3  ;;  %v472_v1 = vmul.f32 %v2022_v63, %v2022_v63  ;;  %v2033_v59 = vadd.f32 %v1946_v43, %v1930_v60  ;;  %v1301_v52 = vld [vmem:[#allocation2 + $0x98] sm:$0xff] }
 0x17c   :  { %v1257_v25 = vpop.eup %1256  ;;  %966 = vst [vmem:[#allocation7 + $0x158] sm:$0xff] %v916_v37  ;;  %v670_v35 = vmul.f32 0.7978846, %v620_v33  ;;  %v545_v32 = vmul.f32 0.044715, %v495_v54  ;;  %v496_v22 = vmul.f32 %v446_v38, %v2015_v23  ;;  %v2038_v28 = vadd.f32 %v1946_v43, %v1937_v40  ;;  %v1302_v38 = vld [vmem:[#allocation2 + $0x168] sm:$0xff] }
 0x17d   :  { %941 = vst [vmem:[#allocation7 + $0x90] sm:$0xff] %v891_v56  ;;  %v767_v12 = vadd.f32 1.0, %v1257_v25  ;;  %v571_v8 = vmul.f32 0.044715, %v521_v17  ;;  %v522_v36 = vmul.f32 %v472_v1, %v2022_v63  ;;  %v447_v21 = vmul.f32 %v2033_v59, %v2033_v59  ;;  %v1303_v17 = vld [vmem:[#allocation2 + $0xa0] sm:$0xff] }
 0x17e   :  { %1268 = vtanh.f32 %v670_v35  ;;  %v595_v60 = vadd.f32 %v545_v32, %v2003_v6  ;;  %v546_v7 = vmul.f32 0.044715, %v496_v22  ;;  %v448_v13 = vmul.f32 %v2038_v28, %v2038_v28  ;;  %v1304_v35 = vld [vmem:[#allocation2 + $0x170] sm:$0xff]  ;;  %v1305_v22 = vld [vmem:[#allocation2 + $0xa8] sm:$0xff] }
 0x17f   :  { %v1259_v18 = vpop.eup %1258  ;;  %v817_v26 = vmul.f32 0.5, %v767_v12  ;;  %v621_v40 = vadd.f32 %v571_v8, %v2008_v3  ;;  %v572_v43 = vmul.f32 0.044715, %v522_v36  ;;  %v497_v45 = vmul.f32 %v447_v21, %v2033_v59 }
 0x180   :  { %v1261_v11 = vpop.eup %1260  ;;  %v742_v62 = vadd.f32 1.0, %v1259_v18  ;;  %v645_v47 = vmul.f32 0.7978846, %v595_v60  ;;  %v596_v9 = vadd.f32 %v546_v7, %v2015_v23  ;;  %v498_v46 = vmul.f32 %v448_v13, %v2038_v28 }
 0x181   :  { %v1263_v39 = vpop.eup %1262  ;;  %v867_v2 = vmul.f32 %v817_v26, %v1926_v4  ;;  %v768_v42 = vadd.f32 1.0, %v1261_v11  ;;  %v671_v16 = vmul.f32 0.7978846, %v621_v40  ;;  %v622_v15 = vadd.f32 %v572_v43, %v2022_v63  ;;  %v1306_v40 = vld [vmem:[#allocation2 + $0x178] sm:$0xff] }
 0x182   :  { %v1265_v53 = vpop.eup %1264  ;;  %v792_v0 = vmul.f32 0.5, %v742_v62  ;;  %v743_v14 = vadd.f32 1.0, %v1263_v39  ;;  %1270 = vtanh.f32 %v645_v47  ;;  %v646_v41 = vmul.f32 0.7978846, %v596_v9 }
 0x183   :  { %v1267_v57 = vpop.eup %1266  ;;  %v917_v44 = vadd.f32 %v1300_v55, %v867_v2  ;;  %v818_v48 = vmul.f32 0.5, %v768_v42  ;;  %v769_v19 = vadd.f32 1.0, %v1265_v53  ;;  %1272 = vtanh.f32 %v671_v16  ;;  %v1307_v42 = vld [vmem:[#allocation2 + $0xb0] sm:$0xff] }
 0x184   :  { %v842_v61 = vmul.f32 %v792_v0, %v1950_v58  ;;  %v793_v24 = vmul.f32 0.5, %v743_v14  ;;  %v744_v10 = vadd.f32 1.0, %v1267_v57  ;;  %1274 = vtanh.f32 %v646_v41  ;;  %v1309_v41 = vld [vmem:[#allocation2 + $0xb8] sm:$0xff] }
 0x185   :  { %967 = vst [vmem:[#allocation7 + $0x160] sm:$0xff] %v917_v44  ;;  %v868_v4 = vmul.f32 %v818_v48, %v1955_v27  ;;  %v819_v5 = vmul.f32 0.5, %v769_v19  ;;  %v672_v20 = vmul.f32 0.7978846, %v622_v15  ;;  %v547_v49 = vmul.f32 0.044715, %v497_v45 }
 0x186   :  { %v892_v34 = vadd.f32 %v1301_v52, %v842_v61  ;;  %v843_v37 = vmul.f32 %v793_v24, %v1961_v29  ;;  %v794_v33 = vmul.f32 0.5, %v744_v10  ;;  %v548_v54 = vmul.f32 0.044715, %v498_v46  ;;  %v1308_v15 = vld [vmem:[#allocation2 + $0x180] sm:$0xff] }
 0x187   :  { %v918_v51 = vadd.f32 %v1302_v38, %v868_v4  ;;  %v869_v56 = vmul.f32 %v819_v5, %v1965_v50  ;;  %1276 = vtanh.f32 %v672_v20  ;;  %v597_v58 = vadd.f32 %v547_v49, %v2033_v59  ;;  %v1311_v4 = vld [vmem:[#allocation2 + $0xc0] sm:$0xff]  ;;  %v1312_v20 = vld [vmem:[#allocation2 + $0xc8] sm:$0xff] }
 0x188   :  { %942 = vst [vmem:[#allocation7 + $0x98] sm:$0xff] %v892_v34  ;;  %v893_v1 = vadd.f32 %v1303_v17, %v843_v37  ;;  %v844_v27 = vmul.f32 %v794_v33, %v1972_v30  ;;  %v598_v25 = vadd.f32 %v548_v54, %v2038_v28 }
 0x189   :  { %968 = vst [vmem:[#allocation7 + $0x168] sm:$0xff] %v918_v51  ;;  %v919_v32 = vadd.f32 %v1304_v35, %v869_v56  ;;  %v647_v29 = vmul.f32 0.7978846, %v597_v58 }
 0x18a   :  { %943 = vst [vmem:[#allocation7 + $0xa0] sm:$0xff] %v893_v1  ;;  %v894_v12 = vadd.f32 %v1305_v22, %v844_v27  ;;  %v648_v8 = vmul.f32 0.7978846, %v598_v25 }
 0x18b   :  { %v1269_v36 = vpop.eup %1268  ;;  %969 = vst [vmem:[#allocation7 + $0x170] sm:$0xff] %v919_v32  ;;  %1278 = vtanh.f32 %v647_v29 }
 0x18c   :  { %944 = vst [vmem:[#allocation7 + $0xa8] sm:$0xff] %v894_v12  ;;  %v770_v50 = vadd.f32 1.0, %v1269_v36  ;;  %1280 = vtanh.f32 %v648_v8 }
 0x18e   :  { %v820_v21 = vmul.f32 0.5, %v770_v50 }
 0x18f   :  { %v1271_v60 = vpop.eup %1270 }
 0x190   :  { %v1273_v7 = vpop.eup %1272  ;;  %v870_v30 = vmul.f32 %v820_v21, %v1988_v31  ;;  %v745_v13 = vadd.f32 1.0, %v1271_v60 }
 0x191   :  { %v1275_v18 = vpop.eup %1274  ;;  %v771_v26 = vadd.f32 1.0, %v1273_v7 }
 0x192   :  { %v920_v43 = vadd.f32 %v1306_v40, %v870_v30  ;;  %v795_v45 = vmul.f32 0.5, %v745_v13  ;;  %v746_v11 = vadd.f32 1.0, %v1275_v18 }
 0x193   :  { %v821_v62 = vmul.f32 0.5, %v771_v26 }
 0x194   :  { %v1277_v47 = vpop.eup %1276  ;;  %970 = vst [vmem:[#allocation7 + $0x178] sm:$0xff] %v920_v43  ;;  %v845_v9 = vmul.f32 %v795_v45, %v2003_v6  ;;  %v796_v46 = vmul.f32 0.5, %v746_v11 }
 0x195   :  { %v871_v39 = vmul.f32 %v821_v62, %v2008_v3  ;;  %v772_v2 = vadd.f32 1.0, %v1277_v47  ;;  %v1310_v3 = vld [vmem:[#allocation2 + $0x188] sm:$0xff] }
 0x196   :  { %v895_v16 = vadd.f32 %v1307_v42, %v845_v9  ;;  %v846_v31 = vmul.f32 %v796_v46, %v2015_v23 }
 0x197   :  { %v921_v53 = vadd.f32 %v1308_v15, %v871_v39  ;;  %v822_v0 = vmul.f32 0.5, %v772_v2 }
 0x198   :  { %v1279_v14 = vpop.eup %1278  ;;  %945 = vst [vmem:[#allocation7 + $0xb0] sm:$0xff] %v895_v16  ;;  %v896_v57 = vadd.f32 %v1309_v41, %v846_v31 }
 0x199   :  { %v1281_v55 = vpop.eup %1280  ;;  %971 = vst [vmem:[#allocation7 + $0x180] sm:$0xff] %v921_v53  ;;  %v872_v44 = vmul.f32 %v822_v0, %v2022_v63  ;;  %v747_v6 = vadd.f32 1.0, %v1279_v14 }
 0x19a   :  { %946 = vst [vmem:[#allocation7 + $0xb8] sm:$0xff] %v896_v57  ;;  %v748_v48 = vadd.f32 1.0, %v1281_v55 }
 0x19b   :  { %v922_v19 = vadd.f32 %v1310_v3, %v872_v44  ;;  %v797_v61 = vmul.f32 0.5, %v747_v6 }
 0x19c   :  { %v798_v24 = vmul.f32 0.5, %v748_v48 }
 0x19d   :  { %972 = vst [vmem:[#allocation7 + $0x188] sm:$0xff] %v922_v19  ;;  %v847_v23 = vmul.f32 %v797_v61, %v2033_v59 }
 0x19e   :  { %v848_v10 = vmul.f32 %v798_v24, %v2038_v28 }
 0x19f   :  { %v897_v5 = vadd.f32 %v1311_v4, %v847_v23 }
 0x1a0   :  { %v898_v49 = vadd.f32 %v1312_v20, %v848_v10 }
 0x1a1   :  { %947 = vst [vmem:[#allocation7 + $0xc0] sm:$0xff] %v897_v5 }
 0x1a2   :  { %948 = vst [vmem:[#allocation7 + $0xc8] sm:$0xff] %v898_v49 }
 0x1a3   :  { %1364 = shalt.err (!%p1361_p0)
}
 0x1a4   :  { %984 = dma.vmem_to_hbm [thread:$0]  %s979_s28, 6400, %s2075_s3, [#allocation4], %s1380_s15, %s1380_s15, %s1381_s16  }
 0x1a5   :  { %1377 = dma.done.wait [#allocation4], 6400  }
 0x1a6   :  { %1378 = vsyncadd [#allocation4], 4294960896 }
 0x1a7   :  { %988 = vsyncpa [#allocation3], 1 }
 0x1a8   :  { %989 = vsyncpa [#allocation6], 1 }
 0x1a9   :  { %990 = vsyncpa [#allocation4], 1 }

</bundles_post_ra>
